<compile_context>
chip_gen: v7x
topology: tpu7x:2x2x1
jax: 0.10.0
libtpu: 0.0.40
codegen_flags: <defaults>
</compile_context>

<pallas_src>
import jax
import jax.numpy as jnp
from jax.experimental import pallas as pl
from jax.experimental.pallas import tpu as pltpu

LN_EPS = 1e-5                      # matches nn.LayerNorm default
_VMEM_LIMIT = 48 * 1024 * 1024     # scoped-VMEM limit, safe on v5e/v6e/v7x (64 MiB)


def _round_up(x, m):
    return -(-x // m) * m


def _is_multi_tc():
    """True on chips with 2 TensorCores (v7x); v5e/v6e have one."""
    try:
        kind = jax.devices()[0].device_kind.lower()
        return ("v7" in kind) or ("7x" in kind)
    except Exception:
        return False


def _choose_tm(rows, target=512):
    """Row tile.  Single-TC chips: one grid step covering every row when it
    fits (avoids per-step overhead).  v7x: keep >=2 steps (128-row multiples)
    so both TensorCores get work.  Large inputs: 512-row tiles (~85% of the
    measured mem-bound HBM roofline, multiple of 128)."""
    if rows <= target:
        if _is_multi_tc() and rows > 256:
            return _round_up(-(-rows // 2), 128)
        return rows                       # block == full row dim (always legal)
    return target


def _compiler_params():
    return pltpu.CompilerParams(dimension_semantics=("parallel",),
                                vmem_limit_bytes=_VMEM_LIMIT)


# ----------------------------- fused Pallas kernels -------------------------

def pallas_pre_attn(src2d, pos2d, ln_g, ln_b, wv, bv, wqa, bqa, softmax_blk,
                    off_pad, aw_pad):
    """LayerNorm1 (pre-norm) + pos add + [value | offset | attn-weight]
    projections + vectorized per-head softmax, fully fused in VMEM.

    Returns: value (R, C) bf16, offsets (R, off_pad) f32, softmaxed attention
    weights (R, aw_pad) f32 — all lane-dense (widths are multiples of 128)."""
    R, C = src2d.shape
    NQ = wqa.shape[1]                       # off_pad + aw_pad
    TM = _choose_tm(R)
    grid = (pl.cdiv(R, TM),)

    def kernel(src_ref, pos_ref, g_ref, b_ref, wv_ref, bv_ref,
               wqa_ref, bqa_ref, blk_ref, val_ref, off_ref, aw_ref):
        x = src_ref[...].astype(jnp.float32)
        # single-pass LayerNorm: var = E[x^2] - E[x]^2 (f32 math)
        mu = jnp.mean(x, axis=-1, keepdims=True)
        var = jnp.mean(x * x, axis=-1, keepdims=True) - mu * mu
        normed = (x - mu) * jax.lax.rsqrt(var + LN_EPS) * g_ref[...] + b_ref[...]
        q = normed + pos_ref[...].astype(jnp.float32)
        # value projection uses the UN-normalized src (pre-norm reference);
        # bf16 MXU operands, f32 accumulation.
        val = jnp.dot(x.astype(jnp.bfloat16), wv_ref[...],
                      preferred_element_type=jnp.float32) + bv_ref[...]
        qa = jnp.dot(q.astype(jnp.bfloat16), wqa_ref[...],
                     preferred_element_type=jnp.float32) + bqa_ref[...]
        # direct sub-slice stores (no concatenates): 128-aligned boundaries.
        val_ref[...] = val.astype(val_ref.dtype)
        off_ref[...] = qa[:, :off_pad]
        logits = qa[:, off_pad:]
        # vectorized per-head softmax: one row-wide max (softmax is shift
        # invariant, valid while heads' logits stay within the f32 exp range),
        # one exp, per-head denominators via a block-diag ones matmul (MXU).
        m = jnp.max(logits, axis=-1, keepdims=True)
        e = jnp.exp(logits - m)
        denom = jnp.dot(e.astype(jnp.bfloat16), blk_ref[...],
                        preferred_element_type=jnp.float32)
        aw_ref[...] = e * pl.reciprocal(denom, approx=True)

    cost = pl.CostEstimate(
        flops=2 * R * C * (C + NQ) + 2 * R * aw_pad * aw_pad,
        transcendentals=R * aw_pad,
        bytes_accessed=R * (4 * C + 2 * C) + 2 * C * (C + NQ)
                       + R * (2 * C + 4 * NQ))

    return pl.pallas_call(
        kernel,
        out_shape=(jax.ShapeDtypeStruct((R, C), jnp.bfloat16),
                   jax.ShapeDtypeStruct((R, off_pad), jnp.float32),
                   jax.ShapeDtypeStruct((R, aw_pad), jnp.float32)),
        grid=grid,
        in_specs=[pl.BlockSpec((TM, C), lambda i: (i, 0)),
                  pl.BlockSpec((TM, C), lambda i: (i, 0)),
                  pl.BlockSpec((1, C), lambda i: (0, 0)),
                  pl.BlockSpec((1, C), lambda i: (0, 0)),
                  pl.BlockSpec((C, C), lambda i: (0, 0)),
                  pl.BlockSpec((1, C), lambda i: (0, 0)),
                  pl.BlockSpec((C, NQ), lambda i: (0, 0)),
                  pl.BlockSpec((1, NQ), lambda i: (0, 0)),
                  pl.BlockSpec((aw_pad, aw_pad), lambda i: (0, 0))],
        out_specs=[pl.BlockSpec((TM, C), lambda i: (i, 0)),
                   pl.BlockSpec((TM, off_pad), lambda i: (i, 0)),
                   pl.BlockSpec((TM, aw_pad), lambda i: (i, 0))],
        compiler_params=_compiler_params(),
        cost_estimate=cost,
    )(src2d, pos2d, ln_g, ln_b, wv, bv, wqa, bqa, softmax_blk)


def pallas_attn_out_ffn(attn2d, src2d, wo, bo, ln_g, ln_b, w1, b1, w2, b2):
    """Attention output projection + residual, then LayerNorm2 (pre-norm) +
    linear1 + exact GELU + linear2 + residual — one fused HBM-bound kernel."""
    R, C = src2d.shape
    F = w1.shape[1]
    TM = _choose_tm(R)
    grid = (pl.cdiv(R, TM),)

    def kernel(a_ref, s_ref, wo_ref, bo_ref, g_ref, bln_ref,
               w1_ref, b1_ref, w2_ref, b2_ref, o_ref):
        y = jnp.dot(a_ref[...].astype(jnp.bfloat16), wo_ref[...],
                    preferred_element_type=jnp.float32) + bo_ref[...]
        x = s_ref[...].astype(jnp.float32) + y            # residual 1 (dropout=0)
        mu = jnp.mean(x, axis=-1, keepdims=True)
        var = jnp.mean(x * x, axis=-1, keepdims=True) - mu * mu
        nrm = (x - mu) * jax.lax.rsqrt(var + LN_EPS) * g_ref[...] + bln_ref[...]
        h = jnp.dot(nrm.astype(jnp.bfloat16), w1_ref[...],
                    preferred_element_type=jnp.float32) + b1_ref[...]
        h = jax.nn.gelu(h, approximate=False)             # exact erf GELU == F.gelu
        y2 = jnp.dot(h.astype(jnp.bfloat16), w2_ref[...],
                     preferred_element_type=jnp.float32) + b2_ref[...]
        o_ref[...] = (x + y2).astype(o_ref.dtype)         # residual 2

    cost = pl.CostEstimate(
        flops=2 * R * C * C + 4 * R * C * F,
        transcendentals=R * F,
        bytes_accessed=4 * R * 3 * C + 2 * (C * C + 2 * C * F))

    return pl.pallas_call(
        kernel,
        out_shape=jax.ShapeDtypeStruct((R, C), jnp.float32),
        grid=grid,
        in_specs=[pl.BlockSpec((TM, C), lambda i: (i, 0)),
                  pl.BlockSpec((TM, C), lambda i: (i, 0)),
                  pl.BlockSpec((C, C), lambda i: (0, 0)),
                  pl.BlockSpec((1, C), lambda i: (0, 0)),
                  pl.BlockSpec((1, C), lambda i: (0, 0)),
                  pl.BlockSpec((1, C), lambda i: (0, 0)),
                  pl.BlockSpec((C, F), lambda i: (0, 0)),
                  pl.BlockSpec((1, F), lambda i: (0, 0)),
                  pl.BlockSpec((F, C), lambda i: (0, 0)),
                  pl.BlockSpec((1, C), lambda i: (0, 0))],
        out_specs=pl.BlockSpec((TM, C), lambda i: (i, 0)),
        compiler_params=_compiler_params(),
        cost_estimate=cost,
    )(attn2d, src2d, wo, bo, ln_g, ln_b, w1, b1, w2, b2)


# ------------------------- MSDeformAttn sampling core -----------------------

def ms_deform_attn_core(value, shapes, loc, aw):
    """grid_sample(bilinear, zeros padding, align_corners=False) + weighted sum.

    value: (N, S, M, Dh) bf16; loc: (N, Lq, M, L, P, 2) in [0,1];
    aw: (N, Lq, M, L, P) f32.
    """
    # TODO(synk): the data-dependent 4-tap gather stays in plain JAX (XLA
    # gather); a VMEM-resident Pallas gather needs per-query dynamic vector
    # indexing that does not lower portably across v5e/v6e/v7x.  Interim wins
    # applied: everything is kept head-major so there is exactly ONE relayout
    # of `value` per layer (vs 8 per level before) and gathered bytes are bf16.
    N, S, M, Dh = value.shape
    Lq, L, P = loc.shape[1], loc.shape[3], loc.shape[4]
    value_t = jnp.transpose(value, (0, 2, 1, 3))            # (N,M,S,Dh) bf16
    loc_t = jnp.transpose(loc, (0, 2, 1, 3, 4, 5))          # (N,M,Lq,L,P,2)
    aw_t = jnp.transpose(aw, (0, 2, 1, 3, 4))               # (N,M,Lq,L,P)
    out = jnp.zeros((N, M, Lq, Dh), jnp.float32)
    start = 0
    for lvl, (H, W) in enumerate(shapes):
        v = value_t[:, :, start:start + H * W]               # (N,M,HW,Dh)
        start += H * W
        x = loc_t[:, :, :, lvl, :, 0] * W - 0.5              # (N,M,Lq,P)
        y = loc_t[:, :, :, lvl, :, 1] * H - 0.5
        x0 = jnp.floor(x)
        y0 = jnp.floor(y)
        fx = x - x0
        fy = y - y0
        x0i = x0.astype(jnp.int32)
        y0i = y0.astype(jnp.int32)
        a_l = aw_t[:, :, :, lvl, :]                          # (N,M,Lq,P)
        for dy in (0, 1):
            for dx in (0, 1):
                xi = x0i + dx
                yi = y0i + dy
                w_c = (fx if dx else 1.0 - fx) * (fy if dy else 1.0 - fy) * a_l
                valid = (xi >= 0) & (xi < W) & (yi >= 0) & (yi < H)
                w_c = jnp.where(valid, w_c, 0.0)
                idx = jnp.clip(yi, 0, H - 1) * W + jnp.clip(xi, 0, W - 1)
                g = jnp.take_along_axis(v, idx.reshape(N, M, Lq * P)[..., None],
                                        axis=2)              # (N,M,Lq*P,Dh) bf16
                g = g.reshape(N, M, Lq, P, Dh).astype(jnp.float32)
                out = out + jnp.sum(w_c[..., None] * g, axis=3)
    return jnp.transpose(out, (0, 2, 1, 3)).reshape(N, Lq, M * Dh)


# ------------------------------ encoder layer --------------------------------

def encoder_layer(src, pos2d_bf16, ref_pts, p, shapes, cfg):
    N, S, C = src.shape
    M, L, P = cfg['heads'], cfg['levels'], cfg['points']
    Dh = C // M
    LP = L * P
    OFFW = M * LP * 2
    AWW = M * LP
    OFFP = _round_up(OFFW, 128)
    AWP = _round_up(AWW, 128)
    a = p['attn']
    # fused: LayerNorm1 + pos add + value/offset/attn-weight projections + softmax
    # (padding_mask is all-False -> value masked_fill is a no-op; dropout=0.0)
    val2d, off2d, aw2d = pallas_pre_attn(
        src.reshape(N * S, C), pos2d_bf16, p['ln1_g'], p['ln1_b'],
        a['wv'], a['bv'], a['wqa'], a['bqa'], a['softmax_blk'], OFFP, AWP)
    value = val2d.reshape(N, S, M, Dh)                       # bf16
    off = off2d[:, :OFFW].reshape(N, S, M, L, P, 2)
    aw = aw2d[:, :AWW].reshape(N, S, M, L, P)
    offset_normalizer = jnp.array([[w, h] for (h, w) in shapes], jnp.float32)  # (L,2)=(W,H)
    loc = (ref_pts[:, :, None, :, None, :]
           + off / offset_normalizer[None, None, None, :, None, :])
    attn = ms_deform_attn_core(value, shapes, loc, aw)       # (N,S,C) f32
    # fused: output projection + residual + LayerNorm2 + FFN + residual
    src = pallas_attn_out_ffn(attn.reshape(N * S, C), src.reshape(N * S, C),
                              a['wo'], a['bo'], p['ln2_g'], p['ln2_b'],
                              p['l1w'], p['l1b'], p['l2w'], p['l2b']).reshape(N, S, C)
    return src


def msdeform_encoder_only_forward(params, srcs, pos_embeds, cfg):
    shapes = [(s.shape[2], s.shape[3]) for s in srcs]
    src_list, pos_list = [], []
    for lvl, (s, pe) in enumerate(zip(srcs, pos_embeds)):
        bs, c, h, w = s.shape
        s = jnp.transpose(s.reshape(bs, c, h * w), (0, 2, 1))
        pe = jnp.transpose(pe.reshape(bs, c, h * w), (0, 2, 1))
        pe = pe + params['level_embed'][lvl][None, None, :]
        src_list.append(s)
        pos_list.append(pe)
    src = jnp.concatenate(src_list, 1)
    pos = jnp.concatenate(pos_list, 1)
    spatial_shapes = jnp.array(shapes, jnp.int32)
    level_start_index = jnp.concatenate(
        [jnp.zeros((1,), jnp.int32),
         jnp.cumsum(jnp.prod(spatial_shapes, axis=1))[:-1].astype(jnp.int32)])

    N, S, C = src.shape
    L = len(shapes)
    # masks are all-zero -> valid_ratios == 1 everywhere; reference points simplify.
    refs = []
    for (H, W) in shapes:
        ys = (jnp.arange(H, dtype=jnp.float32) + 0.5) / H
        xs = (jnp.arange(W, dtype=jnp.float32) + 0.5) / W
        refs.append(jnp.stack([jnp.tile(xs, H), jnp.repeat(ys, W)], -1))
    ref = jnp.concatenate(refs, 0)                                # (S, 2)
    ref_pts = jnp.broadcast_to(ref[None, :, None, :], (N, S, L, 2))

    # pos (+level embed) is re-read once per layer -> store bf16 (HBM-bound).
    pos2d_bf16 = pos.reshape(N * S, C).astype(jnp.bfloat16)

    out = src
    for layer_p in params['layers']:
        out = encoder_layer(out, pos2d_bf16, ref_pts, layer_p, shapes, cfg)
    return out, spatial_shapes, level_start_index


# ------------------------------- param init ----------------------------------

def init_params(key, cfg):
    C, M, L, P, F, depth = (cfg['d_model'], cfg['heads'], cfg['levels'],
                            cfg['points'], cfg['ffn'], cfg['depth'])
    OFFW, AWW = M * L * P * 2, M * L * P
    OFFP, AWP = _round_up(OFFW, 128), _round_up(AWW, 128)
    lp = L * P
    kit = iter(jax.random.split(key, 8 * depth + 4))

    def xavier(fin, fout):
        limit = (6.0 / (fin + fout)) ** 0.5
        return jax.random.uniform(next(kit), (fin, fout), jnp.float32, -limit, limit)

    def lin(fin, fout):
        # weights stored bf16 (MXU operands), biases f32 rows (1, fout)
        return xavier(fin, fout).astype(jnp.bfloat16), jnp.zeros((1, fout), jnp.float32)

    # block-diagonal ones matrix for the vectorized per-head softmax
    # (identity on the padded diagonal so padded denominators stay non-zero).
    idx = jnp.arange(AWP)
    same_head = (idx[:, None] // lp) == (idx[None, :] // lp)
    real = (idx[:, None] < AWW) & (idx[None, :] < AWW)
    pad_diag = (idx[:, None] == idx[None, :]) & (idx[:, None] >= AWW)
    softmax_blk = jnp.where((same_head & real) | pad_diag, 1.0, 0.0).astype(jnp.bfloat16)

    params = {'level_embed': jax.random.normal(next(kit), (L, C), jnp.float32),
              'layers': []}
    for _ in range(depth):
        wv, bv = lin(C, C)
        # fused, lane-padded [offset | attention-weight] projection:
        # columns [0, OFFW) real offsets, [OFFP, OFFP+AWW) real aw logits,
        # zero elsewhere so every consumer segment is 128-lane aligned.
        woff = xavier(C, OFFW).astype(jnp.bfloat16)
        waw = xavier(C, AWW).astype(jnp.bfloat16)
        wqa = jnp.zeros((C, OFFP + AWP), jnp.bfloat16)
        wqa = wqa.at[:, :OFFW].set(woff).at[:, OFFP:OFFP + AWW].set(waw)
        bqa = jnp.zeros((1, OFFP + AWP), jnp.float32)
        wo, bo = lin(C, C)
        w1, b1 = lin(C, F)
        w2, b2 = lin(F, C)
        params['layers'].append({
            'attn': {'wv': wv, 'bv': bv, 'wqa': wqa, 'bqa': bqa,
                     'wo': wo, 'bo': bo, 'softmax_blk': softmax_blk},
            'ln1_g': jnp.ones((1, C), jnp.float32), 'ln1_b': jnp.zeros((1, C), jnp.float32),
            'ln2_g': jnp.ones((1, C), jnp.float32), 'ln2_b': jnp.zeros((1, C), jnp.float32),
            'l1w': w1, 'l1b': b1, 'l2w': w2, 'l2b': b2,
        })
    return params


# ----------------------------------- main -------------------------------------

if __name__ == "__main__":
    # pre_norm=True and activation='gelu' match the reference module defaults.
    cfg = dict(d_model=128, heads=8, levels=3, points=4, ffn=256, depth=2)
    shapes = [(8, 8), (4, 4), (2, 2)]
    bs = 2

    root = jax.random.PRNGKey(0)
    k_params, k_src, k_pos = jax.random.split(root, 3)
    params = init_params(k_params, cfg)

    srcs = [jax.random.normal(jax.random.fold_in(k_src, i),
                              (bs, cfg['d_model'], H, W), jnp.float32)
            for i, (H, W) in enumerate(shapes)]
    pos_embeds = [jax.random.normal(jax.random.fold_in(k_pos, i),
                                    (bs, cfg['d_model'], H, W), jnp.float32)
                  for i, (H, W) in enumerate(shapes)]

    memory, spatial_shapes, level_start_index = msdeform_encoder_only_forward(
        params, srcs, pos_embeds, cfg)
    jax.block_until_ready(memory)
    assert memory.shape == (bs, sum(h * w for h, w in shapes), cfg['d_model'])
    assert bool(jnp.all(jnp.isfinite(memory)))
    print("KERNEL_OK")
</pallas_src>

<mosaic_0001>
module attributes {stable_mosaic.version = 11 : i64} {
  func.func @kernel(%arg0: i32, %arg1: memref<168x128xf32, #tpu.memory_space<vmem>>, %arg2: memref<168x128xbf16, #tpu.memory_space<vmem>>, %arg3: memref<1x128xf32, #tpu.memory_space<vmem>>, %arg4: memref<1x128xf32, #tpu.memory_space<vmem>>, %arg5: memref<128x128xbf16, #tpu.memory_space<vmem>>, %arg6: memref<1x128xf32, #tpu.memory_space<vmem>>, %arg7: memref<128x384xbf16, #tpu.memory_space<vmem>>, %arg8: memref<1x384xf32, #tpu.memory_space<vmem>>, %arg9: memref<128x128xbf16, #tpu.memory_space<vmem>>, %arg10: memref<168x128xbf16, #tpu.memory_space<vmem>>, %arg11: memref<168x256xf32, #tpu.memory_space<vmem>>, %arg12: memref<168x128xf32, #tpu.memory_space<vmem>>) attributes {dimension_semantics = [#tpu.dimension_semantics<parallel>], iteration_bounds = array<i64: 1>, scalar_prefetch = 0 : i64, scratch_operands = 0 : i64, tpu.core_type = #tpu.core_type<tc>, window_params = [{transform_indices = @transform_0, window_bounds = array<i64: 168, 128>}, {transform_indices = @transform_1, window_bounds = array<i64: 168, 128>}, {pipeline_mode = #tpu.pipeline_mode<synchronous>, transform_indices = @transform_2, window_bounds = array<i64: 1, 128>}, {pipeline_mode = #tpu.pipeline_mode<synchronous>, transform_indices = @transform_3, window_bounds = array<i64: 1, 128>}, {pipeline_mode = #tpu.pipeline_mode<synchronous>, transform_indices = @transform_4, window_bounds = array<i64: 128, 128>}, {pipeline_mode = #tpu.pipeline_mode<synchronous>, transform_indices = @transform_5, window_bounds = array<i64: 1, 128>}, {pipeline_mode = #tpu.pipeline_mode<synchronous>, transform_indices = @transform_6, window_bounds = array<i64: 128, 384>}, {pipeline_mode = #tpu.pipeline_mode<synchronous>, transform_indices = @transform_7, window_bounds = array<i64: 1, 384>}, {pipeline_mode = #tpu.pipeline_mode<synchronous>, transform_indices = @transform_8, window_bounds = array<i64: 128, 128>}, {transform_indices = @transform_9, window_bounds = array<i64: 168, 128>}, {transform_indices = @transform_10, window_bounds = array<i64: 168, 256>}, {transform_indices = @transform_11, window_bounds = array<i64: 168, 128>}]} {
    %c0 = arith.constant 0 : index
    %c0_0 = arith.constant 0 : index
    %0 = vector.load %arg1[%c0, %c0_0] : memref<168x128xf32, #tpu.memory_space<vmem>>, vector<168x128xf32>
    %cst = arith.constant dense<0.000000e+00> : vector<168xf32>
    %1 = vector.multi_reduction <add>, %0, %cst [1] : vector<168x128xf32> to vector<168xf32>
    %2 = vector.shape_cast %1 : vector<168xf32> to vector<168x1xf32>
    %cst_1 = arith.constant 1.280000e+02 : f32
    %3 = vector.broadcast %cst_1 : f32 to vector<168x1xf32>
    %4 = arith.divf %2, %3 : vector<168x1xf32>
    %5 = arith.mulf %0, %0 : vector<168x128xf32>
    %cst_2 = arith.constant dense<0.000000e+00> : vector<168xf32>
    %6 = vector.multi_reduction <add>, %5, %cst_2 [1] : vector<168x128xf32> to vector<168xf32>
    %7 = vector.shape_cast %6 : vector<168xf32> to vector<168x1xf32>
    %cst_3 = arith.constant 1.280000e+02 : f32
    %8 = vector.broadcast %cst_3 : f32 to vector<168x1xf32>
    %9 = arith.divf %7, %8 : vector<168x1xf32>
    %10 = arith.mulf %4, %4 : vector<168x1xf32>
    %11 = arith.subf %9, %10 : vector<168x1xf32>
    %12 = vector.broadcast %4 : vector<168x1xf32> to vector<168x128xf32>
    %13 = arith.subf %0, %12 : vector<168x128xf32>
    %cst_4 = arith.constant 9.99999974E-6 : f32
    %14 = vector.broadcast %cst_4 : f32 to vector<168x1xf32>
    %15 = arith.addf %11, %14 : vector<168x1xf32>
    %16 = math.rsqrt %15 : vector<168x1xf32>
    %17 = vector.broadcast %16 : vector<168x1xf32> to vector<168x128xf32>
    %18 = arith.mulf %13, %17 : vector<168x128xf32>
    %c0_5 = arith.constant 0 : index
    %c0_6 = arith.constant 0 : index
    %19 = vector.load %arg3[%c0_5, %c0_6] : memref<1x128xf32, #tpu.memory_space<vmem>>, vector<1x128xf32>
    %20 = vector.broadcast %19 : vector<1x128xf32> to vector<168x128xf32>
    %21 = arith.mulf %18, %20 : vector<168x128xf32>
    %c0_7 = arith.constant 0 : index
    %c0_8 = arith.constant 0 : index
    %22 = vector.load %arg4[%c0_7, %c0_8] : memref<1x128xf32, #tpu.memory_space<vmem>>, vector<1x128xf32>
    %23 = vector.broadcast %22 : vector<1x128xf32> to vector<168x128xf32>
    %24 = arith.addf %21, %23 : vector<168x128xf32>
    %c0_9 = arith.constant 0 : index
    %c0_10 = arith.constant 0 : index
    %25 = vector.load %arg2[%c0_9, %c0_10] : memref<168x128xbf16, #tpu.memory_space<vmem>>, vector<168x128xbf16>
    %26 = arith.extf %25 : vector<168x128xbf16> to vector<168x128xf32>
    %27 = arith.addf %24, %26 : vector<168x128xf32>
    %28 = arith.truncf %0 : vector<168x128xf32> to vector<168x128xbf16>
    %c0_11 = arith.constant 0 : index
    %c0_12 = arith.constant 0 : index
    %29 = vector.load %arg5[%c0_11, %c0_12] : memref<128x128xbf16, #tpu.memory_space<vmem>>, vector<128x128xbf16>
    %cst_13 = arith.constant dense<0.000000e+00> : vector<168x128xf32>
    %30 = tpu.matmul %28, %29, %cst_13 {dimension_numbers = #tpu.dot_dimension_numbers<[1], [0], [0], [1], [0, 0, 1, 1], [], []>} : vector<168x128xbf16>, vector<128x128xbf16>, vector<168x128xf32> -> vector<168x128xf32>
    %c0_14 = arith.constant 0 : index
    %c0_15 = arith.constant 0 : index
    %31 = vector.load %arg6[%c0_14, %c0_15] : memref<1x128xf32, #tpu.memory_space<vmem>>, vector<1x128xf32>
    %32 = vector.broadcast %31 : vector<1x128xf32> to vector<168x128xf32>
    %33 = arith.addf %30, %32 : vector<168x128xf32>
    %34 = arith.truncf %27 : vector<168x128xf32> to vector<168x128xbf16>
    %c0_16 = arith.constant 0 : index
    %c0_17 = arith.constant 0 : index
    %35 = vector.load %arg7[%c0_16, %c0_17] : memref<128x384xbf16, #tpu.memory_space<vmem>>, vector<128x384xbf16>
    %cst_18 = arith.constant dense<0.000000e+00> : vector<168x384xf32>
    %36 = tpu.matmul %34, %35, %cst_18 {dimension_numbers = #tpu.dot_dimension_numbers<[1], [0], [0], [1], [0, 0, 1, 1], [], []>} : vector<168x128xbf16>, vector<128x384xbf16>, vector<168x384xf32> -> vector<168x384xf32>
    %c0_19 = arith.constant 0 : index
    %c0_20 = arith.constant 0 : index
    %37 = vector.load %arg8[%c0_19, %c0_20] : memref<1x384xf32, #tpu.memory_space<vmem>>, vector<1x384xf32>
    %38 = vector.broadcast %37 : vector<1x384xf32> to vector<168x384xf32>
    %39 = arith.addf %36, %38 : vector<168x384xf32>
    %40 = arith.truncf %33 : vector<168x128xf32> to vector<168x128xbf16>
    %c0_21 = arith.constant 0 : index
    %c0_22 = arith.constant 0 : index
    %41 = vector.load %arg10[%c0_21, %c0_22] : memref<168x128xbf16, #tpu.memory_space<vmem>>, vector<168x128xbf16>
    tpu.vector_store %arg10[%c0_21, %c0_22], %40 {strides = array<i32>} : memref<168x128xbf16, #tpu.memory_space<vmem>>, vector<168x128xbf16>,
    %42 = vector.extract_strided_slice %39 {offsets = [0, 0], sizes = [168, 256], strides = [1, 1]} : vector<168x384xf32> to vector<168x256xf32>
    %c0_23 = arith.constant 0 : index
    %c0_24 = arith.constant 0 : index
    %43 = vector.load %arg11[%c0_23, %c0_24] : memref<168x256xf32, #tpu.memory_space<vmem>>, vector<168x256xf32>
    tpu.vector_store %arg11[%c0_23, %c0_24], %42 {strides = array<i32>} : memref<168x256xf32, #tpu.memory_space<vmem>>, vector<168x256xf32>,
    %44 = vector.extract_strided_slice %39 {offsets = [0, 256], sizes = [168, 128], strides = [1, 1]} : vector<168x384xf32> to vector<168x128xf32>
    %cst_25 = arith.constant dense<0xFF800000> : vector<168xf32>
    %45 = vector.multi_reduction <maximumf>, %44, %cst_25 [1] : vector<168x128xf32> to vector<168xf32>
    %46 = vector.shape_cast %45 : vector<168xf32> to vector<168x1xf32>
    %47 = vector.broadcast %46 : vector<168x1xf32> to vector<168x128xf32>
    %48 = arith.subf %44, %47 : vector<168x128xf32>
    %49 = math.exp %48 : vector<168x128xf32>
    %50 = arith.truncf %49 : vector<168x128xf32> to vector<168x128xbf16>
    %c0_26 = arith.constant 0 : index
    %c0_27 = arith.constant 0 : index
    %51 = vector.load %arg9[%c0_26, %c0_27] : memref<128x128xbf16, #tpu.memory_space<vmem>>, vector<128x128xbf16>
    %cst_28 = arith.constant dense<0.000000e+00> : vector<168x128xf32>
    %52 = tpu.matmul %50, %51, %cst_28 {dimension_numbers = #tpu.dot_dimension_numbers<[1], [0], [0], [1], [0, 0, 1, 1], [], []>} : vector<168x128xbf16>, vector<128x128xbf16>, vector<168x128xf32> -> vector<168x128xf32>
    %53 = tpu.reciprocal %52 {approx = true} : vector<168x128xf32> -> vector<168x128xf32>
    %54 = arith.mulf %49, %53 : vector<168x128xf32>
    %c0_29 = arith.constant 0 : index
    %c0_30 = arith.constant 0 : index
    %55 = vector.load %arg12[%c0_29, %c0_30] : memref<168x128xf32, #tpu.memory_space<vmem>>, vector<168x128xf32>
    tpu.vector_store %arg12[%c0_29, %c0_30], %54 {strides = array<i32>} : memref<168x128xf32, #tpu.memory_space<vmem>>, vector<168x128xf32>,
    return
  }
  func.func @transform_0(%arg0: i32) -> (i32, i32) {
    %c0_i32 = arith.constant 0 : i32
    %c0_i32_0 = arith.constant 0 : i32
    return %arg0, %c0_i32 : i32, i32
  }
  func.func @transform_1(%arg0: i32) -> (i32, i32) {
    %c0_i32 = arith.constant 0 : i32
    %c0_i32_0 = arith.constant 0 : i32
    return %arg0, %c0_i32 : i32, i32
  }
  func.func @transform_2(%arg0: i32) -> (i32, i32) {
    %c0_i32 = arith.constant 0 : i32
    %c0_i32_0 = arith.constant 0 : i32
    %c0_i32_1 = arith.constant 0 : i32
    return %c0_i32, %c0_i32_0 : i32, i32
  }
  func.func @transform_3(%arg0: i32) -> (i32, i32) {
    %c0_i32 = arith.constant 0 : i32
    %c0_i32_0 = arith.constant 0 : i32
    %c0_i32_1 = arith.constant 0 : i32
    return %c0_i32, %c0_i32_0 : i32, i32
  }
  func.func @transform_4(%arg0: i32) -> (i32, i32) {
    %c0_i32 = arith.constant 0 : i32
    %c0_i32_0 = arith.constant 0 : i32
    %c0_i32_1 = arith.constant 0 : i32
    return %c0_i32, %c0_i32_0 : i32, i32
  }
  func.func @transform_5(%arg0: i32) -> (i32, i32) {
    %c0_i32 = arith.constant 0 : i32
    %c0_i32_0 = arith.constant 0 : i32
    %c0_i32_1 = arith.constant 0 : i32
    return %c0_i32, %c0_i32_0 : i32, i32
  }
  func.func @transform_6(%arg0: i32) -> (i32, i32) {
    %c0_i32 = arith.constant 0 : i32
    %c0_i32_0 = arith.constant 0 : i32
    %c0_i32_1 = arith.constant 0 : i32
    return %c0_i32, %c0_i32_0 : i32, i32
  }
  func.func @transform_7(%arg0: i32) -> (i32, i32) {
    %c0_i32 = arith.constant 0 : i32
    %c0_i32_0 = arith.constant 0 : i32
    %c0_i32_1 = arith.constant 0 : i32
    return %c0_i32, %c0_i32_0 : i32, i32
  }
  func.func @transform_8(%arg0: i32) -> (i32, i32) {
    %c0_i32 = arith.constant 0 : i32
    %c0_i32_0 = arith.constant 0 : i32
    %c0_i32_1 = arith.constant 0 : i32
    return %c0_i32, %c0_i32_0 : i32, i32
  }
  func.func @transform_9(%arg0: i32) -> (i32, i32) {
    %c0_i32 = arith.constant 0 : i32
    %c0_i32_0 = arith.constant 0 : i32
    return %arg0, %c0_i32 : i32, i32
  }
  func.func @transform_10(%arg0: i32) -> (i32, i32) {
    %c0_i32 = arith.constant 0 : i32
    %c0_i32_0 = arith.constant 0 : i32
    return %arg0, %c0_i32 : i32, i32
  }
  func.func @transform_11(%arg0: i32) -> (i32, i32) {
    %c0_i32 = arith.constant 0 : i32
    %c0_i32_0 = arith.constant 0 : i32
    return %arg0, %c0_i32 : i32, i32
  }
}

</mosaic_0001>

<bundles_post_ra>
// kernel: tpu_custom_call.1
= control target key start
LH: loop header
LB: loop body
LE: loop exit
PB: predicated region body
PF: predicated region fallthrough
CT: control target
= control target key end

     0   :  { %17 = vsyncpa [#allocation3], 0  ;;  %s3387_s0 = inlined_call_operand.hbm [shape: f32[168,128], index: 0, kind: input, shape index: {}]   ;;  %s3388_s1 = inlined_call_operand.hbm [shape: bf16[168,128], index: 1, kind: input, shape index: {}]   ;;  %s3389_s2 = inlined_call_operand.vmem [shape: f32[1,128], index: 2, kind: input, shape index: {}]   ;;  %s3390_s3 = inlined_call_operand.vmem [shape: f32[1,128], index: 3, kind: input, shape index: {}]   ;;  %s3391_s4 = inlined_call_operand.hbm [shape: bf16[128,128], index: 4, kind: input, shape index: {}]   ;;  %s3392_s5 = inlined_call_operand.vmem [shape: f32[1,128], index: 5, kind: input, shape index: {}]   ;;  %s3393_s6 = inlined_call_operand.hbm [shape: bf16[128,384], index: 6, kind: input, shape index: {}]   ;;  %s3394_s7 = inlined_call_operand.vmem [shape: f32[1,384], index: 7, kind: input, shape index: {}]   ;;  %s3395_s8 = inlined_call_operand.hbm [shape: bf16[128,128], index: 8, kind: input, shape index: {}]   ;;  %s3396_s9 = inlined_call_operand.hbm [shape: bf16[168,128], index: 9, kind: output, shape index: {0}]   ;;  %s3397_s10 = inlined_call_operand.hbm [shape: f32[168,256], index: 10, kind: output, shape index: {1}]   ;;  %s3398_s11 = inlined_call_operand.hbm [shape: f32[168,128], index: 11, kind: output, shape index: {2}]  }
   0x1   :  { %18 = vsyncpa [#allocation6], 0 }
   0x2   :  { %19 = vsyncpa [#allocation9], 0 }
   0x3   :  { %20 = vsyncpa [#allocation4], 0 }
   0x4   :  { %21 = vsyncpa [#allocation13], 0  ;;  %s2541_s17 = smov [#allocation5]   ;;  %s2355_s21 = scalar_lea.hbm %s3388_s1, 1344 }
   0x5   :  { %s39_s18 = sshll.u32 %s2541_s17, 4  ;;  %p2356_p0 = scmp.ne.s32.totalorder %s3388_s1, %s2355_s21  ;;  %s40_s18 = int_to_ptr.vmem [resolvable:$true] %s39_s18 }
   0x6   :  { %p2359_p1 = scmp.lt.u32.totalorder %s2355_s21, %s3388_s1 }
   0x8   :  { %p2361_p2 = pnand %p2359_p1, %p2356_p0 }
   0xa   :  { %2364 = shalt.err (!%p2361_p2)
}
   0xb   :  { %s2365_s26 = scalar_lea.vmem %s40_s18, 1344  ;;  %p2370_p4 = scmp.lt.s32.totalorder %s40_s18, %s40_s18 }
   0xc   :  { %p2366_p3 = scmp.ne.s32.totalorder %s40_s18, %s2365_s26  ;;  %p2371_p5 = scmp.lt.s32.totalorder %s2365_s26, %s2365_s26 }
   0xe   :  { %p2372_p6 = por %p2371_p5, %p2370_p4 }
  0x10   :  { %p2373_p7 = pnand %p2372_p6, %p2366_p3 }
  0x12   :  { %2376 = shalt.err (!%p2373_p7)
}
  0x13   :  { %s2542_s27 = smov 64   ;;  %s2543_s28 = smov 4  }
  0x14   :  { %45 = dma.hbm_to_vmem [thread:$0]  %s3388_s1, 1344, %s40_s18, [#allocation6], %s2542_s27, %s2542_s27, %s2543_s28  }
  0x15   :  { %s2544_s12 = smov [#allocation8]   ;;  %s2377_s16 = scalar_lea.hbm %s3393_s6, 3072 }
  0x16   :  { %s69_s13 = sshll.u32 %s2544_s12, 4  ;;  %p2378_p8 = scmp.ne.s32.totalorder %s3393_s6, %s2377_s16  ;;  %s70_s13 = int_to_ptr.vmem [resolvable:$true] %s69_s13 }
  0x17   :  { %p2381_p9 = scmp.lt.u32.totalorder %s2377_s16, %s3393_s6 }
  0x19   :  { %p2383_p10 = pnand %p2381_p9, %p2378_p8 }
  0x1b   :  { %2386 = shalt.err (!%p2383_p10)
}
  0x1c   :  { %s2387_s22 = scalar_lea.vmem %s70_s13, 3072  ;;  %p2392_p12 = scmp.lt.s32.totalorder %s70_s13, %s70_s13 }
  0x1d   :  { %p2388_p11 = scmp.ne.s32.totalorder %s70_s13, %s2387_s22  ;;  %p2393_p13 = scmp.lt.s32.totalorder %s2387_s22, %s2387_s22 }
  0x1f   :  { %p2394_p0 = por %p2393_p13, %p2392_p12 }
  0x21   :  { %p2395_p1 = pnand %p2394_p0, %p2388_p11 }
  0x23   :  { %2398 = shalt.err (!%p2395_p1)
}
  0x24   :  { %s2545_s1 = smov 192   ;;  %s2546_s18 = smov 12  }
  0x25   :  { %75 = dma.hbm_to_vmem [thread:$0]  %s3393_s6, 3072, %s70_s13, [#allocation9], %s2545_s1, %s2545_s1, %s2546_s18  }
  0x26   :  { %s2547_s25 = smov [#allocation2]   ;;  %s2399_s12 = scalar_lea.hbm %s3387_s0, 2688 }
  0x27   :  { %s27_s26 = sshll.u32 %s2547_s25, 4  ;;  %p2400_p2 = scmp.ne.s32.totalorder %s3387_s0, %s2399_s12  ;;  %s28_s26 = int_to_ptr.vmem [resolvable:$true] %s27_s26 }
  0x28   :  { %p2403_p3 = scmp.lt.u32.totalorder %s2399_s12, %s3387_s0 }
  0x2a   :  { %p2405_p4 = pnand %p2403_p3, %p2400_p2 }
  0x2c   :  { %2408 = shalt.err (!%p2405_p4)
}
  0x2d   :  { %s2409_s19 = scalar_lea.vmem %s28_s26, 2688  ;;  %p2414_p6 = scmp.lt.s32.totalorder %s28_s26, %s28_s26 }
  0x2e   :  { %p2410_p5 = scmp.ne.s32.totalorder %s28_s26, %s2409_s19  ;;  %p2415_p7 = scmp.lt.s32.totalorder %s2409_s19, %s2409_s19 }
  0x30   :  { %p2416_p8 = por %p2415_p7, %p2414_p6 }
  0x32   :  { %p2417_p9 = pnand %p2416_p8, %p2410_p5 }
  0x34   :  { %2420 = shalt.err (!%p2417_p9)
}
  0x35   :  { %s2548_s6 = smov 128   ;;  %s2549_s13 = smov 8  }
  0x36   :  { %33 = dma.hbm_to_vmem [thread:$0]  %s3387_s0, 2688, %s28_s26, [#allocation3], %s2548_s6, %s2548_s6, %s2549_s13  }
  0x37   :  { %s2550_s22 = smov [#allocation7]   ;;  %s2551_s18 = smov [#allocation10]  }
  0x38   :  { %s55_s1 = sshll.u32 %s2550_s22, 4  ;;  %s83_s23 = sshll.u32 %s2551_s18, 4  ;;  %s56_s1 = int_to_ptr.vmem [resolvable:$true] %s55_s1  ;;  %s84_s23 = int_to_ptr.vmem [resolvable:$true] %s83_s23 }
  0x39   :  { %s2421_s29 = scalar_lea.hbm %s3391_s4, 1024 }
  0x3a   :  { %p2422_p10 = scmp.ne.s32.totalorder %s3391_s4, %s2421_s29  ;;  %p2425_p11 = scmp.lt.u32.totalorder %s2421_s29, %s3391_s4 }
  0x3c   :  { %p2427_p12 = pnand %p2425_p11, %p2422_p10 }
  0x3e   :  { %2430 = shalt.err (!%p2427_p12)
}
  0x3f   :  { %s2431_s0 = scalar_lea.vmem %s56_s1, 1024  ;;  %p2436_p0 = scmp.lt.s32.totalorder %s56_s1, %s56_s1 }
  0x40   :  { %p2432_p13 = scmp.ne.s32.totalorder %s56_s1, %s2431_s0  ;;  %p2437_p1 = scmp.lt.s32.totalorder %s2431_s0, %s2431_s0 }
  0x42   :  { %p2438_p2 = por %p2437_p1, %p2436_p0 }
  0x44   :  { %p2439_p3 = pnand %p2438_p2, %p2432_p13 }
  0x46   :  { %2442 = shalt.err (!%p2439_p3)
}
  0x47   :  { %61 = dma.hbm_to_vmem [thread:$0]  %s3391_s4, 1024, %s56_s1, [#allocation6], %s2542_s27, %s2542_s27, %s2543_s28  }
  0x48   :  { %s2443_s20 = scalar_lea.hbm %s3395_s8, 1024 }
  0x49   :  { %p2444_p4 = scmp.ne.s32.totalorder %s3395_s8, %s2443_s20  ;;  %p2447_p5 = scmp.lt.u32.totalorder %s2443_s20, %s3395_s8 }
  0x4b   :  { %p2449_p6 = pnand %p2447_p5, %p2444_p4 }
  0x4d   :  { %2452 = shalt.err (!%p2449_p6)
}
  0x4e   :  { %s2453_s25 = scalar_lea.vmem %s84_s23, 1024  ;;  %p2458_p8 = scmp.lt.s32.totalorder %s84_s23, %s84_s23 }
  0x4f   :  { %p2454_p7 = scmp.ne.s32.totalorder %s84_s23, %s2453_s25  ;;  %p2459_p9 = scmp.lt.s32.totalorder %s2453_s25, %s2453_s25 }
  0x51   :  { %p2460_p10 = por %p2459_p9, %p2458_p8 }
  0x53   :  { %p2461_p11 = pnand %p2460_p10, %p2454_p7 }
  0x55   :  { %2464 = shalt.err (!%p2461_p11)
}
  0x56   :  { %89 = dma.hbm_to_vmem [thread:$0]  %s3395_s8, 1024, %s84_s23, [#allocation9], %s2542_s27, %s2542_s27, %s2543_s28  }
  0x57   :  { %2531 = dma.done.wait [#allocation3], 2688  }
  0x58   :  { %2532 = vsyncadd [#allocation3], 4294964608 }
  0x59   :  { %2533 = dma.done.wait [#allocation6], 2368  }
  0x5a   :  { %2534 = vsyncadd [#allocation6], 4294964928 }
  0x5b   :  { %2535 = dma.done.wait [#allocation9], 4096  }
  0x5c   :  { %2536 = vsyncadd [#allocation9], 4294963200  ;;  %v2552_v0 = vmov 0.0   ;;  %vm2553_vm0 = vmmov 0   ;;  %v2695_v1 = vld [vmem:[#allocation2] sm:$0xff]  ;;  %v2697_v2 = vld [vmem:[#allocation2 + $0x8] sm:$0xff] }
  0x5d   :  { %1982 = vmatprep.subr.bf16.mxu0 %v2552_v0  ;;  %1998 = vmatprep.mubr.msk.bf16.mxu0 %vm2553_vm0, %v2552_v0  ;;  %v191_v3 = vmul.f32 %v2695_v1, %v2695_v1  ;;  %v192_v4 = vmul.f32 %v2697_v2, %v2697_v2  ;;  %v2181_v5 = vld [vmem:[#allocation7] sm:$0xff]   ;;  %v2705_v6 = vld [vmem:[#allocation2 + $0x10] sm:$0xff]  ;;  %v2182_v7 = vld [vmem:[#allocation7 + $0x8] sm:$0xff]   ;;  %v520_v37 = vpack.c.bf16 %v2697_v2, %v2695_v1  ;;  %v2554_v56 = vmov 0   ;;  %s2556_s15 = smov [#allocation11]  }
  0x5e   :  { %127 = vadd.xlane.f32.xlu0 %v2695_v1  ;;  %1983 = vmatpush3.bf16.msra.mxu0 %v2181_v5  ;;  %v2707_v8 = vld [vmem:[#allocation2 + $0x18] sm:$0xff]  ;;  %v193_v9 = vmul.f32 %v2705_v6, %v2705_v6  ;;  %v2183_v11 = vld [vmem:[#allocation7 + $0x10] sm:$0xff]   ;;  %v2717_v12 = vld [vmem:[#allocation2 + $0x20] sm:$0xff]  ;;  %s1687_s0 = sshll.u32 %s2556_s15, 4  ;;  %s1688_s0 = int_to_ptr.vmem [resolvable:$true] %s1687_s0 }
  0x5f   :  { %212 = vadd.xlane.f32.xlu1 %v191_v3  ;;  %1984 = vmatprep.subr.bf16.mxu0 %v2552_v0  ;;  %v194_v10 = vmul.f32 %v2707_v8, %v2707_v8  ;;  %v2184_v13 = vld [vmem:[#allocation7 + $0x18] sm:$0xff]   ;;  %v2719_v14 = vld [vmem:[#allocation2 + $0x28] sm:$0xff]  ;;  %v195_v15 = vmul.f32 %v2717_v12, %v2717_v12  ;;  %v2185_v17 = vld [vmem:[#allocation7 + $0x20] sm:$0xff]   ;;  %v521_v47 = vpack.c.bf16 %v2707_v8, %v2705_v6 }
  0x60   :  { %v196_v16 = vmul.f32 %v2719_v14, %v2719_v14  ;;  %v2728_v18 = vld [vmem:[#allocation2 + $0x30] sm:$0xff]  ;;  %v2195_v19 = vld [vmem:[#allocation8 + $0x4] ss:$12 sps:$4 sm:$0xff]   ;;  %v2197_v20 = vld [vmem:[#allocation8] ss:$12 sps:$4 sm:$0xff]   ;;  %942 = vmatprep.mubr.bf16.mxu1 %v2554_v56  ;;  %v522_v58 = vpack.c.bf16 %v2719_v14, %v2717_v12 }
  0x61   :  { %v2186_v21 = vld [vmem:[#allocation7 + $0x28] sm:$0xff]   ;;  %v2731_v23 = vld [vmem:[#allocation2 + $0x38] sm:$0xff]  ;;  %910 = vmatprep.subr.bf16.mxu1 %v2195_v19  ;;  %v2200_v24 = vld [vmem:[#allocation8 + $0x18] ss:$12 sps:$4 sm:$0xff]   ;;  %v197_v25 = vmul.f32 %v2728_v18, %v2728_v18 }
  0x62   :  { %129 = vadd.xlane.f32.xlu0 %v2697_v2  ;;  %1985 = vmatpush3.bf16.msra.mxu0 %v2182_v7  ;;  %v2198_v22 = vld [vmem:[#allocation8 + $0x1c] ss:$12 sps:$4 sm:$0xff]   ;;  %v2187_v26 = vld [vmem:[#allocation7 + $0x30] sm:$0xff]   ;;  %v198_v28 = vmul.f32 %v2731_v23, %v2731_v23  ;;  %v2205_v33 = vld [vmem:[#allocation8 + $0x4c] ss:$12 sps:$4 sm:$0xff]   ;;  %v523_v5 = vpack.c.bf16 %v2731_v23, %v2728_v18 }
  0x63   :  { %214 = vadd.xlane.f32.xlu1 %v192_v4  ;;  %1986 = vmatprep.subr.bf16.mxu0 %v2552_v0  ;;  %v2201_v27 = vld [vmem:[#allocation8 + $0x34] ss:$12 sps:$4 sm:$0xff]   ;;  %v2203_v29 = vld [vmem:[#allocation8 + $0x30] ss:$12 sps:$4 sm:$0xff]   ;;  %v2740_v30 = vld [vmem:[#allocation2 + $0x40] sm:$0xff] }
  0x64   :  { %911 = vmatpush1.bf16.msra.mxu1 %v2197_v20  ;;  %v2188_v31 = vld [vmem:[#allocation7 + $0x38] sm:$0xff]   ;;  %v2743_v32 = vld [vmem:[#allocation2 + $0x48] sm:$0xff]  ;;  %v2207_v34 = vld [vmem:[#allocation8 + $0x48] ss:$12 sps:$4 sm:$0xff]   ;;  %v199_v35 = vmul.f32 %v2740_v30, %v2740_v30 }
  0x65   :  { %912 = vmatprep.subr.bf16.mxu1 %v2198_v22  ;;  %v2208_v36 = vld [vmem:[#allocation8 + $0x64] ss:$12 sps:$4 sm:$0xff]   ;;  %v200_v38 = vmul.f32 %v2743_v32, %v2743_v32  ;;  %v2189_v39 = vld [vmem:[#allocation8 + $0x8] ss:$12 sps:$4 sm:$0xff]   ;;  %v2210_v40 = vld [vmem:[#allocation8 + $0x60] ss:$12 sps:$4 sm:$0xff]  }
  0x66   :  { %131 = vadd.xlane.f32.xlu0 %v2705_v6  ;;  %1987 = vmatpush3.bf16.msra.mxu0 %v2183_v11  ;;  %v2755_v41 = vld [vmem:[#allocation2 + $0x50] sm:$0xff]  ;;  %v2211_v42 = vld [vmem:[#allocation8 + $0x7c] ss:$12 sps:$4 sm:$0xff]   ;;  %v2190_v43 = vld [vmem:[#allocation8 + $0x20] ss:$12 sps:$4 sm:$0xff]  }
  0x67   :  { %133 = vadd.xlane.f32.xlu1 %v2707_v8  ;;  %1988 = vmatprep.subr.bf16.mxu0 %v2552_v0  ;;  %v2757_v44 = vld [vmem:[#allocation2 + $0x58] sm:$0xff]  ;;  %v201_v45 = vmul.f32 %v2755_v41, %v2755_v41  ;;  %v2213_v46 = vld [vmem:[#allocation8 + $0x78] ss:$12 sps:$4 sm:$0xff]   ;;  %v2775_v54 = vld [vmem:[#allocation2 + $0x68] sm:$0xff] }
  0x68   :  { %913 = vmatpush1.bf16.msra.mxu1 %v2200_v24  ;;  %v2215_v48 = vld [vmem:[#allocation8 + $0x94] ss:$12 sps:$4 sm:$0xff]   ;;  %v202_v49 = vmul.f32 %v2757_v44, %v2757_v44  ;;  %v2191_v50 = vld [vmem:[#allocation8 + $0x38] ss:$12 sps:$4 sm:$0xff]   ;;  %v2217_v52 = vld [vmem:[#allocation8 + $0x90] ss:$12 sps:$4 sm:$0xff]   ;;  %v204_v60 = vmul.f32 %v2775_v54, %v2775_v54  ;;  %v525_v22 = vpack.c.bf16 %v2757_v44, %v2755_v41 }
  0x69   :  { %914 = vmatprep.subr.bf16.mxu1 %v2201_v27  ;;  %v2771_v51 = vld [vmem:[#allocation2 + $0x60] sm:$0xff]  ;;  %v2218_v53 = vld [vmem:[#allocation8 + $0xac] ss:$12 sps:$4 sm:$0xff]   ;;  %v2192_v55 = vld [vmem:[#allocation8 + $0x50] ss:$12 sps:$4 sm:$0xff]  }
  0x6a   :  { %216 = vadd.xlane.f32.xlu0 %v193_v9  ;;  %1989 = vmatpush3.bf16.msra.mxu0 %v2184_v13  ;;  %v203_v57 = vmul.f32 %v2771_v51, %v2771_v51  ;;  %v2220_v59 = vld [vmem:[#allocation8 + $0xa8] ss:$12 sps:$4 sm:$0xff]   ;;  %v2792_v63 = vld [vmem:[#allocation2 + $0x78] sm:$0xff]  ;;  %v2204_v9 = vld [vmem:[#allocation8 + $0x98] ss:$12 sps:$4 sm:$0xff]   ;;  %v526_v27 = vpack.c.bf16 %v2775_v54, %v2771_v51 }
  0x6b   :  { %218 = vadd.xlane.f32.xlu1 %v194_v10  ;;  %1990 = vmatprep.subr.bf16.mxu0 %v2552_v0  ;;  %v2193_v61 = vld [vmem:[#allocation8 + $0x68] ss:$12 sps:$4 sm:$0xff]   ;;  %v2194_v3 = vld [vmem:[#allocation8 + $0x80] ss:$12 sps:$4 sm:$0xff]   ;;  %v206_v7 = vmul.f32 %v2792_v63, %v2792_v63  ;;  %v2214_v13 = vld [vmem:[#allocation8 + $0xb0] ss:$12 sps:$4 sm:$0xff]  }
  0x6c   :  { %915 = vmatpush1.bf16.msra.mxu1 %v2203_v29  ;;  %v2788_v62 = vld [vmem:[#allocation2 + $0x70] sm:$0xff]  ;;  %v2805_v10 = vld [vmem:[#allocation2 + $0x80] sm:$0xff]  ;;  %v2809_v11 = vld [vmem:[#allocation2 + $0x88] sm:$0xff] }
  0x6d   :  { %916 = vmatprep.subr.bf16.mxu1 %v2205_v33  ;;  %v205_v4 = vmul.f32 %v2788_v62, %v2788_v62  ;;  %v2820_v19 = vld [vmem:[#allocation2 + $0x90] sm:$0xff]  ;;  %v2824_v20 = vld [vmem:[#allocation2 + $0x98] sm:$0xff]  ;;  %v528_v29 = vpack.c.bf16 %v2809_v11, %v2805_v10 }
  0x6e   :  { %135 = vadd.xlane.f32.xlu0 %v2717_v12  ;;  %1991 = vmatpush3.bf16.msra.mxu0 %v2185_v17  ;;  %v208_v17 = vmul.f32 %v2809_v11, %v2809_v11  ;;  %v210_v24 = vmul.f32 %v2824_v20, %v2824_v20 }
  0x6f   :  { %137 = vadd.xlane.f32.xlu1 %v2719_v14  ;;  %1992 = vmatprep.subr.bf16.mxu0 %v2552_v0 }
  0x70   :  { %917 = vmatpush1.bf16.msra.mxu1 %v2207_v34 }
  0x71   :  { %918 = vmatprep.subr.bf16.mxu1 %v2208_v36 }
  0x72   :  { %220 = vadd.xlane.f32.xlu0 %v195_v15  ;;  %1993 = vmatpush3.bf16.msra.mxu0 %v2186_v21  ;;  %v207_v15 = vmul.f32 %v2805_v10, %v2805_v10  ;;  %v209_v21 = vmul.f32 %v2820_v19, %v2820_v19 }
  0x73   :  { %222 = vadd.xlane.f32.xlu1 %v196_v16  ;;  %1994 = vmatprep.subr.bf16.mxu0 %v2552_v0  ;;  %v524_v16 = vpack.c.bf16 %v2743_v32, %v2740_v30 }
  0x74   :  { %919 = vmatpush1.bf16.msra.mxu1 %v2210_v40 }
  0x75   :  { %920 = vmatprep.subr.bf16.mxu1 %v2211_v42 }
  0x76   :  { %139 = vadd.xlane.f32.xlu0 %v2728_v18  ;;  %1995 = vmatpush3.bf16.msra.mxu0 %v2187_v26 }
  0x77   :  { %141 = vadd.xlane.f32.xlu1 %v2731_v23  ;;  %1996 = vmatprep.subr.bf16.mxu0 %v2552_v0 }
  0x78   :  { %921 = vmatpush1.bf16.msra.mxu1 %v2213_v46 }
  0x79   :  { %922 = vmatprep.subr.bf16.mxu1 %v2215_v48 }
  0x7a   :  { %224 = vadd.xlane.f32.xlu0 %v197_v25  ;;  %1997 = vmatpush3.bf16.msra.mxu0 %v2188_v31  ;;  %v2834_v25 = vld [vmem:[#allocation2 + $0xa0] sm:$0xff]  ;;  %v529_v31 = vpack.c.bf16 %v2824_v20, %v2820_v19 }
  0x7b   :  { %226 = vadd.xlane.f32.xlu1 %v198_v28  ;;  %2042 = vmatprep.subr.bf16.mxu0 %v2552_v0  ;;  %v211_v26 = vmul.f32 %v2834_v25, %v2834_v25  ;;  %v527_v28 = vpack.c.bf16 %v2792_v63, %v2788_v62  ;;  %v530_v33 = vpack.c.bf16 %v2834_v25, %v2834_v25 }
  0x7c   :  { %923 = vmatpush1.bf16.msra.mxu1 %v2217_v52 }
  0x7d   :  { %1999 = vmatmul.mubr.bf16.vlgmr.msra.gmra.mrb[0].mxu0 %v520_v37  ;;  %924 = vmatprep.subr.bf16.mxu1 %v2218_v53 }
  0x7e   :  { %143 = vadd.xlane.f32.xlu0 %v2740_v30  ;;  %2043 = vmatpush3.bf16.msra.mxu0 %v2189_v39 }
  0x7f   :  { %145 = vadd.xlane.f32.xlu1 %v2743_v32  ;;  %2002 = vmatprep.mubr.msk.bf16.mxu0 %vm2553_vm0, %v2552_v0 }
  0x80   :  { %2044 = vmatprep.subr.bf16.mxu0 %v2552_v0  ;;  %925 = vmatpush1.bf16.msra.mxu1 %v2220_v59 }
  0x81   :  { %2102 = vmatprep.subr.bf16.mxu1 %v2552_v0 }
  0x82   :  { %228 = vadd.xlane.f32.xlu0 %v199_v35  ;;  %2045 = vmatpush3.bf16.msra.mxu0 %v2190_v43 }
  0x83   :  { %230 = vadd.xlane.f32.xlu1 %v200_v38  ;;  %2046 = vmatprep.subr.bf16.mxu0 %v2552_v0 }
  0x85   :  { %2003 = vmatmul.mubr.bf16.gmra.mrb[4].mxu0 %v521_v47 }
  0x86   :  { %147 = vadd.xlane.f32.xlu0 %v2755_v41  ;;  %2006 = vmatprep.mubr.msk.bf16.mxu0 %vm2553_vm0, %v2552_v0 }
  0x87   :  { %149 = vadd.xlane.f32.xlu1 %v2757_v44  ;;  %2047 = vmatpush3.bf16.msra.mxu0 %v2191_v50 }
  0x88   :  { %2048 = vmatprep.subr.bf16.mxu0 %v2552_v0 }
  0x8a   :  { %232 = vadd.xlane.f32.xlu0 %v201_v45 }
  0x8b   :  { %234 = vadd.xlane.f32.xlu1 %v202_v49  ;;  %2049 = vmatpush3.bf16.msra.mxu0 %v2192_v55 }
  0x8c   :  { %2050 = vmatprep.subr.bf16.mxu0 %v2552_v0 }
  0x8d   :  { %2007 = vmatmul.mubr.bf16.gmra.mrb[8].mxu0 %v522_v58 }
  0x8e   :  { %151 = vadd.xlane.f32.xlu0 %v2771_v51  ;;  %2010 = vmatprep.mubr.msk.bf16.mxu0 %vm2553_vm0, %v2552_v0 }
  0x8f   :  { %153 = vadd.xlane.f32.xlu1 %v2775_v54  ;;  %2051 = vmatpush3.bf16.msra.mxu0 %v2193_v61 }
  0x90   :  { %2052 = vmatprep.subr.bf16.mxu0 %v2552_v0 }
  0x92   :  { %236 = vadd.xlane.f32.xlu0 %v203_v57 }
  0x93   :  { %238 = vadd.xlane.f32.xlu1 %v204_v60  ;;  %2053 = vmatpush3.bf16.msra.mxu0 %v2194_v3 }
  0x94   :  { %2054 = vmatprep.subr.bf16.mxu0 %v2552_v0 }
  0x95   :  { %2011 = vmatmul.mubr.bf16.gmra.mrb[12].mxu0 %v523_v5 }
  0x96   :  { %155 = vadd.xlane.f32.xlu0 %v2788_v62  ;;  %2014 = vmatprep.mubr.msk.bf16.mxu0 %vm2553_vm0, %v2552_v0 }
  0x97   :  { %157 = vadd.xlane.f32.xlu1 %v2792_v63  ;;  %2055 = vmatpush3.bf16.msra.mxu0 %v2204_v9 }
  0x98   :  { %2056 = vmatprep.subr.bf16.mxu0 %v2552_v0 }
  0x9a   :  { %240 = vadd.xlane.f32.xlu0 %v205_v4 }
  0x9b   :  { %242 = vadd.xlane.f32.xlu1 %v206_v7  ;;  %2057 = vmatpush3.bf16.msra.mxu0 %v2214_v13 }
  0x9d   :  { %2015 = vmatmul.mubr.bf16.gmra.mrb[16].mxu0 %v524_v16 }
  0x9e   :  { %159 = vadd.xlane.f32.xlu0 %v2805_v10  ;;  %2018 = vmatprep.mubr.msk.bf16.mxu0 %vm2553_vm0, %v2552_v0 }
  0x9f   :  { %161 = vadd.xlane.f32.xlu1 %v2809_v11 }
  0xa2   :  { %244 = vadd.xlane.f32.xlu0 %v207_v15 }
  0xa3   :  { %246 = vadd.xlane.f32.xlu1 %v208_v17 }
  0xa5   :  { %2019 = vmatmul.mubr.bf16.gmra.mrb[20].mxu0 %v525_v22 }
  0xa6   :  { %163 = vadd.xlane.f32.xlu0 %v2820_v19  ;;  %2022 = vmatprep.mubr.msk.bf16.mxu0 %vm2553_vm0, %v2552_v0 }
  0xa7   :  { %165 = vadd.xlane.f32.xlu1 %v2824_v20 }
  0xaa   :  { %248 = vadd.xlane.f32.xlu0 %v209_v21 }
  0xab   :  { %250 = vadd.xlane.f32.xlu1 %v210_v24  ;;  %v2873_v24 = vld [vmem:[%s3389_s2] ss:$0 sm:$0xff] }
  0xad   :  { %2023 = vmatmul.mubr.bf16.gmra.mrb[24].mxu0 %v526_v27 }
  0xae   :  { %167 = vadd.xlane.f32.xlu0 %v2834_v25  ;;  %2026 = vmatprep.mubr.msk.bf16.mxu0 %vm2553_vm0, %v2552_v0 }
  0xaf   :  { %252 = vadd.xlane.f32.xlu1 %v211_v26 }
  0xb5   :  { %2027 = vmatmul.mubr.bf16.gmra.mrb[28].mxu0 %v527_v28 }
  0xb6   :  { %2030 = vmatprep.mubr.msk.bf16.mxu0 %vm2553_vm0, %v2552_v0 }
  0xbd   :  { %2031 = vmatmul.mubr.bf16.gmra.mrb[32].mxu0 %v528_v29 }
  0xbe   :  { %2034 = vmatprep.mubr.msk.bf16.mxu0 %vm2553_vm0, %v2552_v0 }
  0xc5   :  { %2035 = vmatmul.mubr.bf16.gmra.mrb[36].mxu0 %v529_v31 }
  0xc6   :  { %2038 = vmatprep.mubr.msk.bf16.mxu0 %vm2553_vm0, %v2552_v0 }
  0xcd   :  { %2039 = vmatmul.mubr.bf16.gmra.mrb[40].mxu0 %v530_v33 }
  0xce   :  { %2058 = vmatprep.mubr.msk.bf16.mxu0 %vm2553_vm0, %v2552_v0 }
  0xeb   :  { %v128_v34 = vpop.xlane.xlu0 %127 }
  0xec   :  { %v170_v35 = vmul.f32 0.0078125, %v128_v34  ;;  %v213_v36 = vpop.xlane.xlu1 %212 }
  0xed   :  { %v254_v38 = vmul.f32 0.0078125, %v213_v36 }
  0xee   :  { %v275_v37 = vmul.f32 %v170_v35, %v170_v35  ;;  %v317_v15 = vsub.f32 %v2695_v1, %v170_v35 }
  0xef   :  { %v130_v39 = vpop.xlane.xlu0 %129 }
  0xf0   :  { %v296_v40 = vsub.f32 %v254_v38, %v275_v37  ;;  %v171_v42 = vmul.f32 0.0078125, %v130_v39  ;;  %v215_v43 = vpop.xlane.xlu1 %214  ;;  %v2884_v38 = vld [vmem:[%s3390_s3] ss:$0 sm:$0xff]  ;;  %v1818_v39 = vld [vmem:[#allocation5] sm:$0xff]  }
  0xf1   :  { %v255_v47 = vmul.f32 0.0078125, %v215_v43 }
  0xf2   :  { %v338_v45 = vadd.f32 1e-05, %v296_v40  ;;  %v276_v46 = vmul.f32 %v171_v42, %v171_v42  ;;  %v318_v1 = vsub.f32 %v2697_v2, %v171_v42 }
  0xf3   :  { %v132_v48 = vpop.xlane.xlu0 %131 }
  0xf4   :  { %2229 = vrsqrt.f32 %v338_v45  ;;  %v297_v49 = vsub.f32 %v255_v47, %v276_v46  ;;  %v172_v50 = vmul.f32 0.0078125, %v132_v48  ;;  %v134_v52 = vpop.xlane.xlu1 %133 }
  0xf5   :  { %v2861_v57 = vmul.f32 0.0078125, %v134_v52  ;;  %v1820_v52 = vunpack.c.h.bf16 %v1818_v39 }
  0xf6   :  { %v339_v53 = vadd.f32 1e-05, %v297_v49  ;;  %v277_v55 = vmul.f32 %v172_v50, %v172_v50  ;;  %v1819_v49 = vunpack.c.l.bf16 %v1818_v39 }
  0xf7   :  { %v217_v58 = vpop.xlane.xlu0 %216  ;;  %v278_v61 = vmul.f32 %v2861_v57, %v2861_v57 }
  0xf8   :  { %2231 = vrsqrt.f32 %v339_v53  ;;  %v256_v59 = vmul.f32 0.0078125, %v217_v58  ;;  %v219_v60 = vpop.xlane.xlu1 %218  ;;  %v319_v58 = vsub.f32 %v2705_v6, %v172_v50 }
  0xf9   :  { %v257_v4 = vmul.f32 0.0078125, %v219_v60 }
  0xfa   :  { %v298_v3 = vsub.f32 %v256_v59, %v277_v55 }
  0xfb   :  { %v136_v5 = vpop.xlane.xlu0 %135  ;;  %v299_v9 = vsub.f32 %v257_v4, %v278_v61 }
  0xfc   :  { %v340_v7 = vadd.f32 1e-05, %v298_v3  ;;  %v2865_v13 = vmul.f32 0.0078125, %v136_v5  ;;  %v138_v16 = vpop.xlane.xlu1 %137  ;;  %v320_v5 = vsub.f32 %v2707_v8, %v2861_v57 }
  0xfd   :  { %v341_v21 = vadd.f32 1e-05, %v299_v9  ;;  %v2875_v26 = vmul.f32 0.0078125, %v138_v16 }
  0xfe   :  { %v2230_v17 = vpop.eup %2229  ;;  %2233 = vrsqrt.f32 %v340_v7  ;;  %v279_v22 = vmul.f32 %v2865_v13, %v2865_v13 }
  0xff   :  { %v221_v27 = vpop.xlane.xlu0 %220  ;;  %v380_v28 = vmul.f32 %v2230_v17, %v317_v15  ;;  %2235 = vrsqrt.f32 %v341_v21  ;;  %v280_v35 = vmul.f32 %v2875_v26, %v2875_v26 }
 0x100   :  { %v258_v29 = vmul.f32 0.0078125, %v221_v27  ;;  %v223_v31 = vpop.xlane.xlu1 %222 }
 0x101   :  { %v408_v33 = vmul.f32 %v2873_v24, %v380_v28  ;;  %v259_v37 = vmul.f32 0.0078125, %v223_v31 }
 0x102   :  { %v2232_v34 = vpop.eup %2231  ;;  %v300_v36 = vsub.f32 %v258_v29, %v279_v22  ;;  %v1907_v22 = vld [vmem:[#allocation5 + $0x8] sm:$0xff]  }
 0x103   :  { %v140_v40 = vpop.xlane.xlu0 %139  ;;  %v381_v43 = vmul.f32 %v2232_v34, %v318_v1  ;;  %v301_v46 = vsub.f32 %v259_v37, %v280_v35  ;;  %v436_v48 = vadd.f32 %v2884_v38, %v408_v33  ;;  %v1824_v37 = vunpack.c.h.bf16 %v1907_v22 }
 0x104   :  { %v342_v45 = vadd.f32 1e-05, %v300_v36  ;;  %v2886_v2 = vmul.f32 0.0078125, %v140_v40  ;;  %v142_v42 = vpop.xlane.xlu1 %141  ;;  %v1823_v36 = vunpack.c.l.bf16 %v1907_v22 }
 0x105   :  { %v409_v47 = vmul.f32 %v2873_v24, %v381_v43  ;;  %v343_v53 = vadd.f32 1e-05, %v301_v46  ;;  %v2893_v59 = vmul.f32 0.0078125, %v142_v42  ;;  %v499_v9 = vadd.f32 %v1819_v49, %v436_v48 }
 0x106   :  { %2237 = vrsqrt.f32 %v342_v45  ;;  %v281_v55 = vmul.f32 %v2886_v2, %v2886_v2  ;;  %v321_v43 = vsub.f32 %v2717_v12, %v2865_v13  ;;  %v322_v49 = vsub.f32 %v2719_v14, %v2875_v26 }
 0x107   :  { %v225_v60 = vpop.xlane.xlu0 %224  ;;  %v437_v61 = vadd.f32 %v2884_v38, %v409_v47  ;;  %2239 = vrsqrt.f32 %v343_v53  ;;  %v282_v21 = vmul.f32 %v2893_v59, %v2893_v59 }
 0x108   :  { %v2234_v3 = vpop.eup %2233  ;;  %v260_v4 = vmul.f32 0.0078125, %v225_v60  ;;  %v227_v7 = vpop.xlane.xlu1 %226 }
 0x109   :  { %v500_v15 = vadd.f32 %v1820_v52, %v437_v61  ;;  %v382_v16 = vmul.f32 %v2234_v3, %v319_v58  ;;  %v2236_v17 = vpop.eup %2235  ;;  %v261_v50 = vmul.f32 0.0078125, %v227_v7  ;;  %v1908_v3 = vld [vmem:[#allocation5 + $0x10] sm:$0xff]  }
 0x10a   :  { %v302_v6 = vsub.f32 %v260_v4, %v281_v55  ;;  %v383_v29 = vmul.f32 %v2236_v17, %v320_v5 }
 0x10b   :  { %v144_v27 = vpop.xlane.xlu0 %143  ;;  %v722_v28 = vpack.c.bf16 %v500_v15, %v499_v9  ;;  %v410_v1 = vmul.f32 %v2873_v24, %v382_v16  ;;  %v303_v33 = vsub.f32 %v261_v50, %v282_v21  ;;  %v1828_v50 = vunpack.c.h.bf16 %v1908_v3 }
 0x10c   :  { %v344_v31 = vadd.f32 1e-05, %v302_v6  ;;  %v2901_v34 = vmul.f32 0.0078125, %v144_v27  ;;  %v146_v8 = vpop.xlane.xlu1 %145  ;;  %v411_v57 = vmul.f32 %v2873_v24, %v383_v29  ;;  %v1827_v6 = vunpack.c.l.bf16 %v1908_v3 }
 0x10d   :  { %943 = vmatmul.mubr.bf16.vlgmr.msra.gmra.mrb[0].mxu1 %v722_v28  ;;  %2059 = vmatmul.mubr.bf16.vlgmr.msra.gmra.mrb[44].mxu0 %v722_v28  ;;  %v438_v35 = vadd.f32 %v2884_v38, %v410_v1  ;;  %v345_v39 = vadd.f32 1e-05, %v303_v33  ;;  %v2912_v45 = vmul.f32 0.0078125, %v146_v8  ;;  %v323_v28 = vsub.f32 %v2728_v18, %v2886_v2 }
 0x10e   :  { %2241 = vrsqrt.f32 %v344_v31  ;;  %v283_v40 = vmul.f32 %v2901_v34, %v2901_v34  ;;  %952 = vmatprep.mubr.bf16.mxu1 %v2554_v56  ;;  %2062 = vmatprep.mubr.msk.bf16.mxu0 %vm2553_vm0, %v2552_v0  ;;  %v439_v42 = vadd.f32 %v2884_v38, %v411_v57  ;;  %v324_v57 = vsub.f32 %v2731_v23, %v2893_v59 }
 0x10f   :  { %v229_v46 = vpop.xlane.xlu0 %228  ;;  %2243 = vrsqrt.f32 %v345_v39  ;;  %v501_v53 = vadd.f32 %v1823_v36, %v438_v35  ;;  %v284_v61 = vmul.f32 %v2912_v45, %v2912_v45  ;;  %v325_v3 = vsub.f32 %v2740_v30, %v2901_v34 }
 0x110   :  { %v2238_v47 = vpop.eup %2237  ;;  %v262_v48 = vmul.f32 0.0078125, %v229_v46  ;;  %v231_v52 = vpop.xlane.xlu1 %230  ;;  %v502_v55 = vadd.f32 %v1824_v37, %v439_v42  ;;  %v1909_v46 = vld [vmem:[#allocation5 + $0x18] sm:$0xff]  }
 0x111   :  { %v384_v58 = vmul.f32 %v2238_v47, %v321_v43  ;;  %v2240_v60 = vpop.eup %2239  ;;  %v263_v13 = vmul.f32 0.0078125, %v231_v52 }
 0x112   :  { %v304_v12 = vsub.f32 %v262_v48, %v283_v40  ;;  %v723_v5 = vpack.c.bf16 %v502_v55, %v501_v53  ;;  %v385_v7 = vmul.f32 %v2240_v60, %v322_v49  ;;  %v1831_v60 = vunpack.c.l.bf16 %v1909_v46 }
 0x113   :  { %v148_v4 = vpop.xlane.xlu0 %147  ;;  %v412_v9 = vmul.f32 %v2873_v24, %v384_v58  ;;  %v305_v16 = vsub.f32 %v263_v13, %v284_v61  ;;  %v1832_v61 = vunpack.c.h.bf16 %v1909_v46 }
 0x114   :  { %v346_v15 = vadd.f32 1e-05, %v304_v12  ;;  %v2920_v17 = vmul.f32 0.0078125, %v148_v4  ;;  %v150_v14 = vpop.xlane.xlu1 %149  ;;  %v413_v26 = vmul.f32 %v2873_v24, %v385_v7 }
 0x115   :  { %953 = vmatmul.mubr.bf16.gmra.mrb[4].mxu1 %v723_v5  ;;  %2063 = vmatmul.mubr.bf16.gmra.mrb[48].mxu0 %v723_v5  ;;  %v440_v21 = vadd.f32 %v2884_v38, %v412_v9  ;;  %v347_v22 = vadd.f32 1e-05, %v305_v16  ;;  %v2931_v29 = vmul.f32 0.0078125, %v150_v14  ;;  %v326_v16 = vsub.f32 %v2743_v32, %v2912_v45 }
 0x116   :  { %2245 = vrsqrt.f32 %v346_v15  ;;  %v285_v27 = vmul.f32 %v2920_v17, %v2920_v17  ;;  %962 = vmatprep.mubr.bf16.mxu1 %v2554_v56  ;;  %2066 = vmatprep.mubr.msk.bf16.mxu0 %vm2553_vm0, %v2552_v0  ;;  %v441_v31 = vadd.f32 %v2884_v38, %v413_v26 }
 0x117   :  { %v233_v1 = vpop.xlane.xlu0 %232  ;;  %2247 = vrsqrt.f32 %v347_v22  ;;  %v503_v36 = vadd.f32 %v1827_v6, %v440_v21  ;;  %v286_v43 = vmul.f32 %v2931_v29, %v2931_v29 }
 0x118   :  { %v2242_v33 = vpop.eup %2241  ;;  %v264_v8 = vmul.f32 0.0078125, %v233_v1  ;;  %v235_v35 = vpop.xlane.xlu1 %234  ;;  %v504_v37 = vadd.f32 %v1828_v50, %v441_v31 }
 0x119   :  { %v386_v39 = vmul.f32 %v2242_v33, %v323_v28  ;;  %v2244_v40 = vpop.eup %2243  ;;  %v265_v2 = vmul.f32 0.0078125, %v235_v35 }
 0x11a   :  { %v306_v18 = vsub.f32 %v264_v8, %v285_v27  ;;  %v724_v47 = vpack.c.bf16 %v504_v37, %v503_v36  ;;  %v387_v48 = vmul.f32 %v2244_v40, %v324_v57  ;;  %v1910_v27 = vld [vmem:[#allocation5 + $0x20] sm:$0xff]  }
 0x11b   :  { %v152_v42 = vpop.xlane.xlu0 %151  ;;  %v414_v49 = vmul.f32 %v2873_v24, %v386_v39  ;;  %v307_v53 = vsub.f32 %v265_v2, %v286_v43  ;;  %v1835_v37 = vunpack.c.l.bf16 %v1910_v27  ;;  %v1836_v39 = vunpack.c.h.bf16 %v1910_v27 }
 0x11c   :  { %v348_v52 = vadd.f32 1e-05, %v306_v18  ;;  %v2939_v55 = vmul.f32 0.0078125, %v152_v42  ;;  %v154_v23 = vpop.xlane.xlu1 %153  ;;  %v415_v59 = vmul.f32 %v2873_v24, %v387_v48  ;;  %v327_v18 = vsub.f32 %v2755_v41, %v2920_v17 }
 0x11d   :  { %963 = vmatmul.mubr.bf16.gmra.mrb[8].mxu1 %v724_v47  ;;  %2067 = vmatmul.mubr.bf16.gmra.mrb[52].mxu0 %v724_v47  ;;  %v442_v58 = vadd.f32 %v2884_v38, %v414_v49  ;;  %v349_v12 = vadd.f32 1e-05, %v307_v53  ;;  %v2950_v4 = vmul.f32 0.0078125, %v154_v23  ;;  %v328_v49 = vsub.f32 %v2757_v44, %v2931_v29 }
 0x11e   :  { %2249 = vrsqrt.f32 %v348_v52  ;;  %v287_v13 = vmul.f32 %v2939_v55, %v2939_v55  ;;  %972 = vmatprep.mubr.bf16.mxu1 %v2554_v56  ;;  %2070 = vmatprep.mubr.msk.bf16.mxu0 %vm2553_vm0, %v2552_v0  ;;  %v443_v7 = vadd.f32 %v2884_v38, %v415_v59 }
 0x11f   :  { %v237_v5 = vpop.xlane.xlu0 %236  ;;  %2251 = vrsqrt.f32 %v349_v12  ;;  %v505_v26 = vadd.f32 %v1831_v60, %v442_v58  ;;  %v288_v22 = vmul.f32 %v2950_v4, %v2950_v4 }
 0x120   :  { %v2246_v9 = vpop.eup %2245  ;;  %v266_v15 = vmul.f32 0.0078125, %v237_v5  ;;  %v239_v14 = vpop.xlane.xlu1 %238  ;;  %v506_v21 = vadd.f32 %v1832_v61, %v443_v7  ;;  %v1911_v61 = vld [vmem:[#allocation5 + $0x28] sm:$0xff]  }
 0x121   :  { %v388_v6 = vmul.f32 %v2246_v9, %v325_v3  ;;  %v2248_v50 = vpop.eup %2247  ;;  %v267_v34 = vmul.f32 0.0078125, %v239_v14  ;;  %v1839_v14 = vunpack.c.l.bf16 %v1911_v61 }
 0x122   :  { %v308_v30 = vsub.f32 %v266_v15, %v287_v13  ;;  %v725_v1 = vpack.c.bf16 %v506_v21, %v505_v26  ;;  %v389_v31 = vmul.f32 %v2248_v50, %v326_v16  ;;  %v1840_v26 = vunpack.c.h.bf16 %v1911_v61 }
 0x123   :  { %v156_v28 = vpop.xlane.xlu0 %155  ;;  %v416_v33 = vmul.f32 %v2873_v24, %v388_v6  ;;  %v309_v57 = vsub.f32 %v267_v34, %v288_v22  ;;  %v329_v50 = vsub.f32 %v2771_v51, %v2939_v55 }
 0x124   :  { %v350_v8 = vadd.f32 1e-05, %v308_v30  ;;  %v2958_v35 = vmul.f32 0.0078125, %v156_v28  ;;  %v158_v32 = vpop.xlane.xlu1 %157  ;;  %v417_v45 = vmul.f32 %v2873_v24, %v389_v31 }
 0x125   :  { %973 = vmatmul.mubr.bf16.gmra.mrb[12].mxu1 %v725_v1  ;;  %2071 = vmatmul.mubr.bf16.gmra.mrb[56].mxu0 %v725_v1  ;;  %v444_v36 = vadd.f32 %v2884_v38, %v416_v33  ;;  %v351_v40 = vadd.f32 1e-05, %v309_v57  ;;  %v2969_v2 = vmul.f32 0.0078125, %v158_v32  ;;  %v330_v1 = vsub.f32 %v2775_v54, %v2950_v4 }
 0x126   :  { %2253 = vrsqrt.f32 %v350_v8  ;;  %v289_v43 = vmul.f32 %v2958_v35, %v2958_v35  ;;  %982 = vmatprep.mubr.bf16.mxu1 %v2554_v56  ;;  %2074 = vmatprep.mubr.msk.bf16.mxu0 %vm2553_vm0, %v2552_v0  ;;  %v445_v42 = vadd.f32 %v2884_v38, %v417_v45 }
 0x127   :  { %v241_v46 = vpop.xlane.xlu0 %240  ;;  %2255 = vrsqrt.f32 %v351_v40  ;;  %v507_v53 = vadd.f32 %v1835_v37, %v444_v36  ;;  %v290_v60 = vmul.f32 %v2969_v2, %v2969_v2  ;;  %v1912_v36 = vld [vmem:[#allocation5 + $0x30] sm:$0xff]   ;;  %v332_v61 = vsub.f32 %v2792_v63, %v2969_v2 }
 0x128   :  { %v2250_v47 = vpop.eup %2249  ;;  %v268_v48 = vmul.f32 0.0078125, %v241_v46  ;;  %v243_v52 = vpop.xlane.xlu1 %242  ;;  %v508_v23 = vadd.f32 %v1836_v39, %v445_v42 }
 0x129   :  { %v390_v59 = vmul.f32 %v2250_v47, %v327_v18  ;;  %v2252_v58 = vpop.eup %2251  ;;  %v269_v17 = vmul.f32 0.0078125, %v243_v52 }
 0x12a   :  { %v310_v41 = vsub.f32 %v268_v48, %v289_v43  ;;  %v726_v13 = vpack.c.bf16 %v508_v23, %v507_v53  ;;  %v391_v3 = vmul.f32 %v2252_v58, %v328_v49  ;;  %v1843_v48 = vunpack.c.l.bf16 %v1912_v36 }
 0x12b   :  { %v160_v12 = vpop.xlane.xlu0 %159  ;;  %v418_v5 = vmul.f32 %v2873_v24, %v390_v59  ;;  %v311_v9 = vsub.f32 %v269_v17, %v290_v60  ;;  %v1844_v49 = vunpack.c.h.bf16 %v1912_v36  ;;  %v331_v23 = vsub.f32 %v2788_v62, %v2958_v35 }
 0x12c   :  { %v352_v7 = vadd.f32 1e-05, %v310_v41  ;;  %v2977_v15 = vmul.f32 0.0078125, %v160_v12  ;;  %v162_v44 = vpop.xlane.xlu1 %161  ;;  %v419_v29 = vmul.f32 %v2873_v24, %v391_v3 }
 0x12d   :  { %983 = vmatmul.mubr.bf16.gmra.mrb[16].mxu1 %v726_v13  ;;  %2075 = vmatmul.mubr.bf16.gmra.mrb[60].mxu0 %v726_v13  ;;  %v446_v16 = vadd.f32 %v2884_v38, %v418_v5  ;;  %v353_v21 = vadd.f32 1e-05, %v311_v9  ;;  %v2988_v22 = vmul.f32 0.0078125, %v162_v44  ;;  %v1913_v44 = vld [vmem:[#allocation5 + $0x38] sm:$0xff]  }
 0x12e   :  { %2257 = vrsqrt.f32 %v352_v7  ;;  %v291_v6 = vmul.f32 %v2977_v15, %v2977_v15  ;;  %992 = vmatprep.mubr.bf16.mxu1 %v2554_v56  ;;  %2078 = vmatprep.mubr.msk.bf16.mxu0 %vm2553_vm0, %v2552_v0  ;;  %v447_v34 = vadd.f32 %v2884_v38, %v419_v29 }
 0x12f   :  { %v245_v30 = vpop.xlane.xlu0 %244  ;;  %2259 = vrsqrt.f32 %v353_v21  ;;  %v509_v33 = vadd.f32 %v1839_v14, %v446_v16  ;;  %v292_v45 = vmul.f32 %v2988_v22, %v2988_v22 }
 0x130   :  { %v2254_v27 = vpop.eup %2253  ;;  %v270_v28 = vmul.f32 0.0078125, %v245_v30  ;;  %v247_v31 = vpop.xlane.xlu1 %246  ;;  %v510_v8 = vadd.f32 %v1840_v26, %v447_v34  ;;  %v1847_v34 = vunpack.c.l.bf16 %v1913_v44 }
 0x131   :  { %v392_v57 = vmul.f32 %v2254_v27, %v329_v50  ;;  %v2256_v32 = vpop.eup %2255  ;;  %v271_v55 = vmul.f32 0.0078125, %v247_v31  ;;  %v1848_v27 = vunpack.c.h.bf16 %v1913_v44  ;;  %v333_v31 = vsub.f32 %v2805_v10, %v2977_v15 }
 0x132   :  { %v312_v51 = vsub.f32 %v270_v28, %v291_v6  ;;  %v727_v39 = vpack.c.bf16 %v510_v8, %v509_v33  ;;  %v393_v40 = vmul.f32 %v2256_v32, %v330_v1  ;;  %v334_v32 = vsub.f32 %v2809_v11, %v2988_v22 }
 0x133   :  { %v164_v37 = vpop.xlane.xlu0 %163  ;;  %v420_v43 = vmul.f32 %v2873_v24, %v392_v57  ;;  %v313_v46 = vsub.f32 %v271_v55, %v292_v45 }
 0x134   :  { %v354_v18 = vadd.f32 1e-05, %v312_v51  ;;  %v2996_v42 = vmul.f32 0.0078125, %v164_v37  ;;  %v166_v54 = vpop.xlane.xlu1 %165  ;;  %v421_v4 = vmul.f32 %v2873_v24, %v393_v40  ;;  %v1914_v37 = vld [vmem:[#allocation5 + $0x40] sm:$0xff]  }
 0x135   :  { %993 = vmatmul.mubr.bf16.gmra.mrb[20].mxu1 %v727_v39  ;;  %2079 = vmatmul.mubr.bf16.gmra.mrb[64].mxu0 %v727_v39  ;;  %v448_v47 = vadd.f32 %v2884_v38, %v420_v43  ;;  %v355_v52 = vadd.f32 1e-05, %v313_v46  ;;  %v3007_v59 = vmul.f32 0.0078125, %v166_v54  ;;  %v1851_v10 = vunpack.c.l.bf16 %v1914_v37 }
 0x136   :  { %2261 = vrsqrt.f32 %v354_v18  ;;  %v293_v53 = vmul.f32 %v2996_v42, %v2996_v42  ;;  %1002 = vmatprep.mubr.bf16.mxu1 %v2554_v56  ;;  %2082 = vmatprep.mubr.msk.bf16.mxu0 %vm2553_vm0, %v2552_v0  ;;  %v449_v60 = vadd.f32 %v2884_v38, %v421_v4  ;;  %v1852_v22 = vunpack.c.h.bf16 %v1914_v37 }
 0x137   :  { %v249_v58 = vpop.xlane.xlu0 %248  ;;  %2263 = vrsqrt.f32 %v355_v52  ;;  %v511_v13 = vadd.f32 %v1843_v48, %v448_v47  ;;  %v294_v9 = vmul.f32 %v3007_v59, %v3007_v59  ;;  %v335_v54 = vsub.f32 %v2820_v19, %v2996_v42 }
 0x138   :  { %v2258_v41 = vpop.eup %2257  ;;  %v272_v17 = vmul.f32 0.0078125, %v249_v58  ;;  %v251_v12 = vpop.xlane.xlu1 %250  ;;  %v512_v3 = vadd.f32 %v1844_v49, %v449_v60  ;;  %v336_v48 = vsub.f32 %v2824_v20, %v3007_v59  ;;  %v1915_v58 = vld [vmem:[#allocation5 + $0x48] sm:$0xff]  }
 0x139   :  { %v394_v5 = vmul.f32 %v2258_v41, %v331_v23  ;;  %v2260_v7 = vpop.eup %2259  ;;  %v273_v35 = vmul.f32 0.0078125, %v251_v12  ;;  %v1855_v42 = vunpack.c.l.bf16 %v1915_v58  ;;  %v1856_v12 = vunpack.c.h.bf16 %v1915_v58 }
 0x13a   :  { %v314_v62 = vsub.f32 %v272_v17, %v293_v53  ;;  %v728_v16 = vpack.c.bf16 %v512_v3, %v511_v13  ;;  %v395_v14 = vmul.f32 %v2260_v7, %v332_v61 }
 0x13b   :  { %v168_v29 = vpop.xlane.xlu0 %167  ;;  %v422_v26 = vmul.f32 %v2873_v24, %v394_v5  ;;  %v315_v6 = vsub.f32 %v273_v35, %v294_v9  ;;  %v477_v5 = vld [vmem:[#allocation5 + $0x50] sm:$0xf] }
 0x13c   :  { %v356_v21 = vadd.f32 1e-05, %v314_v62  ;;  %v190_v50 = vmul.f32 0.0078125, %v168_v29  ;;  %v253_v63 = vpop.xlane.xlu1 %252  ;;  %v423_v2 = vmul.f32 %v2873_v24, %v395_v14  ;;  %v498_v44 = vunpack.c.l.bf16 %v477_v5 }
 0x13d   :  { %1003 = vmatmul.mubr.bf16.gmra.mrb[24].mxu1 %v728_v16  ;;  %2083 = vmatmul.mubr.bf16.gmra.mrb[68].mxu0 %v728_v16  ;;  %v450_v30 = vadd.f32 %v2884_v38, %v422_v26  ;;  %v357_v28 = vadd.f32 1e-05, %v315_v6  ;;  %v274_v33 = vmul.f32 0.0078125, %v253_v63 }
 0x13e   :  { %2265 = vrsqrt.f32 %v356_v21  ;;  %v295_v1 = vmul.f32 %v190_v50, %v190_v50  ;;  %1012 = vmatprep.mubr.bf16.mxu1 %v2554_v56  ;;  %2086 = vmatprep.mubr.msk.bf16.mxu0 %vm2553_vm0, %v2552_v0  ;;  %v451_v8 = vadd.f32 %v2884_v38, %v423_v2  ;;  %v337_v13 = vsub.f32 %v2834_v25, %v190_v50  ;;  %v3049_v25 = vld [vmem:[%s3392_s5] ss:$0 sm:$0xff] }
 0x13f   :  { %2267 = vrsqrt.f32 %v357_v28  ;;  %v513_v51 = vadd.f32 %v1847_v34, %v450_v30 }
 0x140   :  { %v2262_v57 = vpop.eup %2261  ;;  %v316_v45 = vsub.f32 %v274_v33, %v295_v1  ;;  %v514_v55 = vadd.f32 %v1848_v27, %v451_v8 }
 0x141   :  { %v396_v36 = vmul.f32 %v2262_v57, %v333_v31  ;;  %v2264_v39 = vpop.eup %2263 }
 0x142   :  { %v358_v40 = vadd.f32 1e-05, %v316_v45  ;;  %v729_v43 = vpack.c.bf16 %v514_v55, %v513_v51  ;;  %v397_v18 = vmul.f32 %v2264_v39, %v334_v32 }
 0x143   :  { %v424_v46 = vmul.f32 %v2873_v24, %v396_v36 }
 0x144   :  { %2269 = vrsqrt.f32 %v358_v40  ;;  %v425_v15 = vmul.f32 %v2873_v24, %v397_v18 }
 0x145   :  { %1013 = vmatmul.mubr.bf16.gmra.mrb[28].mxu1 %v729_v43  ;;  %2087 = vmatmul.mubr.bf16.gmra.mrb[72].mxu0 %v729_v43  ;;  %v452_v11 = vadd.f32 %v2884_v38, %v424_v46 }
 0x146   :  { %1022 = vmatprep.mubr.bf16.mxu1 %v2554_v56  ;;  %2090 = vmatprep.mubr.msk.bf16.mxu0 %vm2553_vm0, %v2552_v0  ;;  %v453_v4 = vadd.f32 %v2884_v38, %v425_v15 }
 0x147   :  { %v515_v49 = vadd.f32 %v1851_v10, %v452_v11 }
 0x148   :  { %v2266_v47 = vpop.eup %2265  ;;  %v516_v52 = vadd.f32 %v1852_v22, %v453_v4 }
 0x149   :  { %v398_v53 = vmul.f32 %v2266_v47, %v335_v54  ;;  %v2268_v23 = vpop.eup %2267 }
 0x14a   :  { %v730_v60 = vpack.c.bf16 %v516_v52, %v515_v49  ;;  %v399_v41 = vmul.f32 %v2268_v23, %v336_v48 }
 0x14b   :  { %v426_v17 = vmul.f32 %v2873_v24, %v398_v53 }
 0x14c   :  { %v427_v61 = vmul.f32 %v2873_v24, %v399_v41 }
 0x14d   :  { %1023 = vmatmul.mubr.bf16.gmra.mrb[32].mxu1 %v730_v60  ;;  %2091 = vmatmul.mubr.bf16.gmra.mrb[76].mxu0 %v730_v60  ;;  %v454_v19 = vadd.f32 %v2884_v38, %v426_v17 }
 0x14e   :  { %1032 = vmatprep.mubr.bf16.mxu1 %v2554_v56  ;;  %2094 = vmatprep.mubr.msk.bf16.mxu0 %vm2553_vm0, %v2552_v0  ;;  %v2270_v20 = vpop.eup %2269  ;;  %v455_v59 = vadd.f32 %v2884_v38, %v427_v61 }
 0x14f   :  { %v400_v3 = vmul.f32 %v2270_v20, %v337_v13  ;;  %v517_v7 = vadd.f32 %v1855_v42, %v454_v19 }
 0x150   :  { %v518_v9 = vadd.f32 %v1856_v12, %v455_v59  ;;  %v636_v16 = vpop.f32.mrb[0].mxu0 }
 0x151   :  { %v428_v62 = vmul.f32 %v2873_v24, %v400_v3  ;;  %v637_v24 = vadd.f32 %v3049_v25, %v636_v16  ;;  %v2000_v26 = vpop.f32.mrb[1].mxu0 }
 0x152   :  { %v731_v35 = vpack.c.bf16 %v518_v9, %v517_v7  ;;  %v639_v21 = vpop.f32.mrb[2].mxu0 }
 0x153   :  { %v456_v29 = vadd.f32 %v2884_v38, %v428_v62  ;;  %v640_v38 = vadd.f32 %v3049_v25, %v639_v21  ;;  %v2001_v6 = vpop.f32.mrb[3].mxu0 }
 0x155   :  { %1033 = vmatmul.mubr.bf16.gmra.mrb[36].mxu1 %v731_v35  ;;  %2095 = vmatmul.mubr.bf16.gmra.mrb[80].mxu0 %v731_v35  ;;  %v519_v14 = vadd.f32 %v498_v44, %v456_v29  ;;  %v1860_v63 = vpack.c.bf16 %v640_v38, %v637_v24 }
 0x156   :  { %1042 = vmatprep.mubr.bf16.mxu1 %v2554_v56  ;;  %2098 = vmatprep.mubr.msk.bf16.mxu0 %vm2553_vm0, %v2552_v0 }
 0x157   :  { %v732_v50 = vpack.c.bf16 %v519_v14, %v519_v14  ;;  %1861 = vst [vmem:[#allocation11] sm:$0xff] %v1860_v63  }
 0x158   :  { %v644_v2 = vpop.f32.mrb[4].mxu0 }
 0x159   :  { %v645_v56 = vadd.f32 %v3049_v25, %v644_v2  ;;  %v2004_v30 = vpop.f32.mrb[5].mxu0 }
 0x15a   :  { %v647_v34 = vpop.f32.mrb[6].mxu0 }
 0x15b   :  { %v648_v27 = vadd.f32 %v3049_v25, %v647_v34  ;;  %v2005_v28 = vpop.f32.mrb[7].mxu0 }
 0x15d   :  { %1043 = vmatmul.mubr.bf16.gmra.mrb[40].mxu1 %v732_v50  ;;  %2099 = vmatmul.mubr.bf16.gmra.mrb[84].mxu0 %v732_v50  ;;  %v1865_v1 = vpack.c.bf16 %v648_v27, %v645_v56 }
 0x15e   :  { %2118 = vmatprep.mubr.msk.bf16.mxu1 %vm2553_vm0, %v2552_v0 }
 0x15f   :  { %1916 = vst [vmem:[#allocation11 + $0x8] sm:$0xff] %v1865_v1  }
 0x160   :  { %v652_v31 = vpop.f32.mrb[8].mxu0 }
 0x161   :  { %v653_v33 = vadd.f32 %v3049_v25, %v652_v31  ;;  %v2008_v8 = vpop.f32.mrb[9].mxu0  ;;  %v2221_v31 = vld [vmem:[#allocation10] sm:$0xff]  }
 0x162   :  { %v655_v57 = vpop.f32.mrb[10].mxu0  ;;  %2103 = vmatpush3.bf16.msra.mxu1 %v2221_v31  ;;  %v2223_v8 = vld [vmem:[#allocation10 + $0x10] sm:$0xff]  }
 0x163   :  { %v656_v32 = vadd.f32 %v3049_v25, %v655_v57  ;;  %v2009_v45 = vpop.f32.mrb[11].mxu0  ;;  %2104 = vmatprep.subr.bf16.mxu1 %v2552_v0  ;;  %v2224_v57 = vld [vmem:[#allocation10 + $0x18] sm:$0xff]  }
 0x164   :  { %v2227_v45 = vld [vmem:[#allocation10 + $0x30] sm:$0xff]  }
 0x165   :  { %v1870_v51 = vpack.c.bf16 %v656_v32, %v653_v33  ;;  %v2222_v33 = vld [vmem:[#allocation10 + $0x8] sm:$0xff]  }
 0x166   :  { %2105 = vmatpush3.bf16.msra.mxu1 %v2222_v33  ;;  %v2226_v32 = vld [vmem:[#allocation10 + $0x28] sm:$0xff]  }
 0x167   :  { %1917 = vst [vmem:[#allocation11 + $0x10] sm:$0xff] %v1870_v51   ;;  %2106 = vmatprep.subr.bf16.mxu1 %v2552_v0  ;;  %v767_v51 = vlaneseq }
 0x168   :  { %v660_v55 = vpop.f32.mrb[12].mxu0 }
 0x169   :  { %v661_v36 = vadd.f32 %v3049_v25, %v660_v55  ;;  %v2012_v37 = vpop.f32.mrb[13].mxu0  ;;  %v768_v55 = vshrl.u32 %v767_v51, 7 }
 0x16a   :  { %v663_v39 = vpop.f32.mrb[14].mxu0  ;;  %2107 = vmatpush3.bf16.msra.mxu1 %v2223_v8 }
 0x16b   :  { %v664_v40 = vadd.f32 %v3049_v25, %v663_v39  ;;  %v2013_v43 = vpop.f32.mrb[15].mxu0  ;;  %2108 = vmatprep.subr.bf16.mxu1 %v2552_v0  ;;  %v777_v37 = vsub.s32 2, %v768_v55  ;;  %v765_v39 = vld [vmem:[%s3394_s7] sm:$0x7]  ;;  %s2555_s7 = smov [#allocation12]  }
 0x16c   :  { %s1699_s14 = sshll.u32 %s2555_s7, 4  ;;  %s1700_s14 = int_to_ptr.vmem [resolvable:$true] %s1699_s14 }
 0x16d   :  { %v1875_v18 = vpack.c.bf16 %v664_v40, %v661_v36  ;;  %v769_v36 = vsub.s32 0, %v768_v55  ;;  %v773_v40 = vsub.s32 1, %v768_v55  ;;  %s2465_s26 = scalar_lea.vmem %s1700_s14, 5376  ;;  %p2470_p13 = scmp.lt.s32.totalorder %s1700_s14, %s1700_s14 }
 0x16e   :  { %2109 = vmatpush3.bf16.msra.mxu1 %v2224_v57  ;;  %p2466_p12 = scmp.ne.s32.totalorder %s1700_s14, %s2465_s26  ;;  %p2471_p0 = scmp.lt.s32.totalorder %s2465_s26, %s2465_s26 }
 0x16f   :  { %1918 = vst [vmem:[#allocation11 + $0x18] sm:$0xff] %v1875_v18   ;;  %2110 = vmatprep.subr.bf16.mxu1 %v2552_v0  ;;  %v3087_v43 = vrot.slane %v765_v39, %v769_v36  ;;  %v3089_v18 = vrot.slane %v765_v39, %v777_v37  ;;  %v2228_v36 = vld [vmem:[#allocation10 + $0x38] sm:$0xff]  }
 0x170   :  { %v668_v46 = vpop.f32.mrb[16].mxu0  ;;  %p2472_p1 = por %p2471_p0, %p2470_p13 }
 0x171   :  { %v669_v10 = vadd.f32 %v3049_v25, %v668_v46  ;;  %v2016_v15 = vpop.f32.mrb[17].mxu0  ;;  %v3091_v46 = vrot.slane %v765_v39, %v773_v40 }
 0x172   :  { %v671_v11 = vpop.f32.mrb[18].mxu0  ;;  %p2473_p2 = pnand %p2472_p1, %p2466_p12 }
 0x173   :  { %v672_v22 = vadd.f32 %v3049_v25, %v671_v11  ;;  %v2017_v54 = vpop.f32.mrb[19].mxu0 }
 0x175   :  { %v1880_v4 = vpack.c.bf16 %v672_v22, %v669_v10 }
 0x177   :  { %1919 = vst [vmem:[#allocation11 + $0x20] sm:$0xff] %v1880_v4  }
 0x178   :  { %v676_v47 = vpop.f32.mrb[20].mxu0 }
 0x179   :  { %v677_v48 = vadd.f32 %v3049_v25, %v676_v47  ;;  %v2020_v49 = vpop.f32.mrb[21].mxu0 }
 0x17a   :  { %v679_v52 = vpop.f32.mrb[22].mxu0 }
 0x17b   :  { %v680_v53 = vadd.f32 %v3049_v25, %v679_v52  ;;  %v2021_v23 = vpop.f32.mrb[23].mxu0 }
 0x17d   :  { %v1885_v58 = vpack.c.bf16 %v680_v53, %v677_v48 }
 0x17f   :  { %1920 = vst [vmem:[#allocation11 + $0x28] sm:$0xff] %v1885_v58  }
 0x180   :  { %v684_v60 = vpop.f32.mrb[24].mxu0 }
 0x181   :  { %v685_v41 = vadd.f32 %v3049_v25, %v684_v60  ;;  %v2024_v17 = vpop.f32.mrb[25].mxu0 }
 0x182   :  { %v687_v61 = vpop.f32.mrb[26].mxu0 }
 0x183   :  { %v688_v19 = vadd.f32 %v3049_v25, %v687_v61  ;;  %v2025_v42 = vpop.f32.mrb[27].mxu0 }
 0x185   :  { %v1890_v12 = vpack.c.bf16 %v688_v19, %v685_v41 }
 0x187   :  { %1921 = vst [vmem:[#allocation11 + $0x30] sm:$0xff] %v1890_v12  }
 0x188   :  { %v692_v13 = vpop.f32.mrb[28].mxu0 }
 0x189   :  { %v693_v20 = vadd.f32 %v3049_v25, %v692_v13  ;;  %v2028_v59 = vpop.f32.mrb[29].mxu0 }
 0x18a   :  { %v695_v3 = vpop.f32.mrb[30].mxu0 }
 0x18b   :  { %v696_v5 = vadd.f32 %v3049_v25, %v695_v3  ;;  %v2029_v7 = vpop.f32.mrb[31].mxu0 }
 0x18d   :  { %v1895_v9 = vpack.c.bf16 %v696_v5, %v693_v20 }
 0x18f   :  { %1922 = vst [vmem:[#allocation11 + $0x38] sm:$0xff] %v1895_v9  }
 0x190   :  { %v700_v62 = vpop.f32.mrb[32].mxu0 }
 0x191   :  { %v701_v35 = vadd.f32 %v3049_v25, %v700_v62  ;;  %v2032_v44 = vpop.f32.mrb[33].mxu0 }
 0x192   :  { %v703_v29 = vpop.f32.mrb[34].mxu0 }
 0x193   :  { %v704_v16 = vadd.f32 %v3049_v25, %v703_v29  ;;  %v2033_v14 = vpop.f32.mrb[35].mxu0 }
 0x195   :  { %v1900_v24 = vpack.c.bf16 %v704_v16, %v701_v35 }
 0x197   :  { %1923 = vst [vmem:[#allocation11 + $0x40] sm:$0xff] %v1900_v24  }
 0x198   :  { %v708_v26 = vpop.f32.mrb[36].mxu0 }
 0x199   :  { %v709_v21 = vadd.f32 %v3049_v25, %v708_v26  ;;  %v2036_v38 = vpop.f32.mrb[37].mxu0 }
 0x19a   :  { %v711_v6 = vpop.f32.mrb[38].mxu0 }
 0x19b   :  { %v712_v50 = vadd.f32 %v3049_v25, %v711_v6  ;;  %v2037_v63 = vpop.f32.mrb[39].mxu0 }
 0x19d   :  { %v1905_v2 = vpack.c.bf16 %v712_v50, %v709_v21 }
 0x19f   :  { %1924 = vst [vmem:[#allocation11 + $0x48] sm:$0xff] %v1905_v2  }
 0x1a0   :  { %v716_v56 = vpop.f32.mrb[40].mxu0 }
 0x1a1   :  { %v717_v30 = vadd.f32 %v3049_v25, %v716_v56  ;;  %v2040_v34 = vpop.f32.mrb[41].mxu0  ;;  %v2225_v25 = vld [vmem:[#allocation10 + $0x20] sm:$0xff]  }
 0x1a2   :  { %v719_v27 = vpop.f32.mrb[42].mxu0  ;;  %2111 = vmatpush3.bf16.msra.mxu1 %v2225_v25 }
 0x1a3   :  { %v1816_v28 = vpack.c.bf16 %v717_v30, %v717_v30  ;;  %v2041_v1 = vpop.f32.mrb[43].mxu0  ;;  %2112 = vmatprep.subr.bf16.mxu1 %v2552_v0 }
 0x1a5   :  { %1276 = vst [vmem:[#allocation11 + $0x50] sm:$0xf] %v1816_v28 }
 0x1a6   :  { %2113 = vmatpush3.bf16.msra.mxu1 %v2226_v32 }
 0x1a7   :  { %2114 = vmatprep.subr.bf16.mxu1 %v2552_v0 }
 0x1aa   :  { %2115 = vmatpush3.bf16.msra.mxu1 %v2227_v45 }
 0x1ab   :  { %2116 = vmatprep.subr.bf16.mxu1 %v2552_v0 }
 0x1ae   :  { %2117 = vmatpush3.bf16.msra.mxu1 %v2228_v36 }
 0x1e0   :  { %v944_v10 = vpop.f32.mrb[0].mxu1  ;;  %v1085_v15 = vpop.f32.mrb[44].mxu0 }
 0x1e1   :  { %v945_v11 = vadd.f32 %v944_v10, %v3087_v43  ;;  %v3095_v22 = vadd.f32 %v1085_v15, %v3089_v18  ;;  %v946_v54 = vpop.f32.mrb[1].mxu1  ;;  %v2060_v4 = vpop.f32.mrb[45].mxu0 }
 0x1e2   :  { %v947_v47 = vadd.f32 %v946_v54, %v3091_v46  ;;  %v948_v48 = vpop.f32.mrb[2].mxu1  ;;  %v1088_v49 = vpop.f32.mrb[46].mxu0 }
 0x1e3   :  { %1277 = vst [vmem:[#allocation12] sm:$0xff] %v945_v11  ;;  %v949_v52 = vadd.f32 %v948_v48, %v3087_v43  ;;  %v3100_v53 = vadd.f32 %v1088_v49, %v3089_v18  ;;  %1319 = vmax.xlane.f32.xlu0 %v3095_v22  ;;  %v950_v23 = vpop.f32.mrb[3].mxu1  ;;  %v2061_v58 = vpop.f32.mrb[47].mxu0 }
 0x1e4   :  { %1278 = vst [vmem:[#allocation12 + $0x8] sm:$0xff] %v947_v47  ;;  %v951_v60 = vadd.f32 %v950_v23, %v3091_v46 }
 0x1e5   :  { %1279 = vst [vmem:[#allocation12 + $0x10] sm:$0xff] %v949_v52  ;;  %1321 = vmax.xlane.f32.xlu1 %v3100_v53 }
 0x1e6   :  { %1280 = vst [vmem:[#allocation12 + $0x18] sm:$0xff] %v951_v60 }
 0x1e8   :  { %v954_v41 = vpop.f32.mrb[4].mxu1  ;;  %v1093_v17 = vpop.f32.mrb[48].mxu0 }
 0x1e9   :  { %v955_v61 = vadd.f32 %v954_v41, %v3087_v43  ;;  %v3107_v19 = vadd.f32 %v1093_v17, %v3089_v18  ;;  %v956_v42 = vpop.f32.mrb[5].mxu1  ;;  %v2064_v12 = vpop.f32.mrb[49].mxu0 }
 0x1ea   :  { %v957_v13 = vadd.f32 %v956_v42, %v3091_v46  ;;  %v958_v20 = vpop.f32.mrb[6].mxu1  ;;  %v1096_v59 = vpop.f32.mrb[50].mxu0 }
 0x1eb   :  { %1281 = vst [vmem:[#allocation12 + $0x20] sm:$0xff] %v955_v61  ;;  %v959_v3 = vadd.f32 %v958_v20, %v3087_v43  ;;  %v3112_v5 = vadd.f32 %v1096_v59, %v3089_v18  ;;  %1323 = vmax.xlane.f32.xlu0 %v3107_v19  ;;  %v960_v7 = vpop.f32.mrb[7].mxu1  ;;  %v2065_v9 = vpop.f32.mrb[51].mxu0 }
 0x1ec   :  { %1282 = vst [vmem:[#allocation12 + $0x28] sm:$0xff] %v957_v13  ;;  %v961_v62 = vadd.f32 %v960_v7, %v3091_v46 }
 0x1ed   :  { %1283 = vst [vmem:[#allocation12 + $0x30] sm:$0xff] %v959_v3  ;;  %1325 = vmax.xlane.f32.xlu1 %v3112_v5 }
 0x1ee   :  { %1284 = vst [vmem:[#allocation12 + $0x38] sm:$0xff] %v961_v62 }
 0x1f0   :  { %v964_v35 = vpop.f32.mrb[8].mxu1  ;;  %v1101_v44 = vpop.f32.mrb[52].mxu0 }
 0x1f1   :  { %v965_v29 = vadd.f32 %v964_v35, %v3087_v43  ;;  %v3119_v16 = vadd.f32 %v1101_v44, %v3089_v18  ;;  %v966_v14 = vpop.f32.mrb[9].mxu1  ;;  %v2068_v24 = vpop.f32.mrb[53].mxu0 }
 0x1f2   :  { %v967_v26 = vadd.f32 %v966_v14, %v3091_v46  ;;  %v968_v21 = vpop.f32.mrb[10].mxu1  ;;  %v1104_v38 = vpop.f32.mrb[54].mxu0 }
 0x1f3   :  { %1285 = vst [vmem:[#allocation12 + $0x40] sm:$0xff] %v965_v29  ;;  %v969_v6 = vadd.f32 %v968_v21, %v3087_v43  ;;  %v3124_v50 = vadd.f32 %v1104_v38, %v3089_v18  ;;  %1327 = vmax.xlane.f32.xlu0 %v3119_v16  ;;  %v970_v63 = vpop.f32.mrb[11].mxu1  ;;  %v2069_v2 = vpop.f32.mrb[55].mxu0 }
 0x1f4   :  { %1286 = vst [vmem:[#allocation12 + $0x48] sm:$0xff] %v967_v26  ;;  %v971_v56 = vadd.f32 %v970_v63, %v3091_v46 }
 0x1f5   :  { %1287 = vst [vmem:[#allocation12 + $0x50] sm:$0xff] %v969_v6  ;;  %1329 = vmax.xlane.f32.xlu1 %v3124_v50 }
 0x1f6   :  { %1288 = vst [vmem:[#allocation12 + $0x58] sm:$0xff] %v971_v56 }
 0x1f8   :  { %v974_v30 = vpop.f32.mrb[12].mxu1  ;;  %v1109_v34 = vpop.f32.mrb[56].mxu0 }
 0x1f9   :  { %v975_v27 = vadd.f32 %v974_v30, %v3087_v43  ;;  %v3131_v28 = vadd.f32 %v1109_v34, %v3089_v18  ;;  %v976_v1 = vpop.f32.mrb[13].mxu1  ;;  %v2072_v31 = vpop.f32.mrb[57].mxu0 }
 0x1fa   :  { %v977_v33 = vadd.f32 %v976_v1, %v3091_v46  ;;  %v978_v8 = vpop.f32.mrb[14].mxu1  ;;  %v1112_v57 = vpop.f32.mrb[58].mxu0 }
 0x1fb   :  { %1289 = vst [vmem:[#allocation12 + $0x60] sm:$0xff] %v975_v27  ;;  %v979_v25 = vadd.f32 %v978_v8, %v3087_v43  ;;  %v3136_v32 = vadd.f32 %v1112_v57, %v3089_v18  ;;  %1331 = vmax.xlane.f32.xlu0 %v3131_v28  ;;  %v980_v45 = vpop.f32.mrb[15].mxu1  ;;  %v2073_v51 = vpop.f32.mrb[59].mxu0 }
 0x1fc   :  { %1290 = vst [vmem:[#allocation12 + $0x68] sm:$0xff] %v977_v33  ;;  %v981_v55 = vadd.f32 %v980_v45, %v3091_v46 }
 0x1fd   :  { %1291 = vst [vmem:[#allocation12 + $0x70] sm:$0xff] %v979_v25  ;;  %1333 = vmax.xlane.f32.xlu1 %v3136_v32 }
 0x1fe   :  { %1292 = vst [vmem:[#allocation12 + $0x78] sm:$0xff] %v981_v55 }
 0x200   :  { %v984_v37 = vpop.f32.mrb[16].mxu1  ;;  %v1117_v39 = vpop.f32.mrb[60].mxu0 }
 0x201   :  { %v985_v40 = vadd.f32 %v984_v37, %v3087_v43  ;;  %v3143_v10 = vadd.f32 %v1117_v39, %v3089_v18  ;;  %v986_v15 = vpop.f32.mrb[17].mxu1  ;;  %v2076_v11 = vpop.f32.mrb[61].mxu0 }
 0x202   :  { %v987_v54 = vadd.f32 %v986_v15, %v3091_v46  ;;  %v988_v4 = vpop.f32.mrb[18].mxu1  ;;  %v1120_v47 = vpop.f32.mrb[62].mxu0 }
 0x203   :  { %1293 = vst [vmem:[#allocation12 + $0x80] sm:$0xff] %v985_v40  ;;  %v989_v48 = vadd.f32 %v988_v4, %v3087_v43  ;;  %v3148_v49 = vadd.f32 %v1120_v47, %v3089_v18  ;;  %1335 = vmax.xlane.f32.xlu0 %v3143_v10  ;;  %v990_v52 = vpop.f32.mrb[19].mxu1  ;;  %v2077_v23 = vpop.f32.mrb[63].mxu0 }
 0x204   :  { %1294 = vst [vmem:[#allocation12 + $0x88] sm:$0xff] %v987_v54  ;;  %v991_v58 = vadd.f32 %v990_v52, %v3091_v46 }
 0x205   :  { %1295 = vst [vmem:[#allocation12 + $0x90] sm:$0xff] %v989_v48  ;;  %1337 = vmax.xlane.f32.xlu1 %v3148_v49 }
 0x206   :  { %1296 = vst [vmem:[#allocation12 + $0x98] sm:$0xff] %v991_v58 }
 0x208   :  { %v994_v60 = vpop.f32.mrb[20].mxu1  ;;  %v1125_v41 = vpop.f32.mrb[64].mxu0 }
 0x209   :  { %v995_v17 = vadd.f32 %v994_v60, %v3087_v43  ;;  %v3155_v61 = vadd.f32 %v1125_v41, %v3089_v18  ;;  %v996_v42 = vpop.f32.mrb[21].mxu1  ;;  %v2080_v12 = vpop.f32.mrb[65].mxu0 }
 0x20a   :  { %v997_v13 = vadd.f32 %v996_v42, %v3091_v46  ;;  %v998_v20 = vpop.f32.mrb[22].mxu1  ;;  %v1128_v59 = vpop.f32.mrb[66].mxu0 }
 0x20b   :  { %1297 = vst [vmem:[#allocation12 + $0xa0] sm:$0xff] %v995_v17  ;;  %v999_v3 = vadd.f32 %v998_v20, %v3087_v43  ;;  %v3160_v7 = vadd.f32 %v1128_v59, %v3089_v18  ;;  %1339 = vmax.xlane.f32.xlu0 %v3155_v61  ;;  %v1000_v9 = vpop.f32.mrb[23].mxu1  ;;  %v2081_v62 = vpop.f32.mrb[67].mxu0 }
 0x20c   :  { %1298 = vst [vmem:[#allocation12 + $0xa8] sm:$0xff] %v997_v13  ;;  %v1001_v35 = vadd.f32 %v1000_v9, %v3091_v46 }
 0x20d   :  { %1299 = vst [vmem:[#allocation12 + $0xb0] sm:$0xff] %v999_v3  ;;  %1341 = vmax.xlane.f32.xlu1 %v3160_v7 }
 0x20e   :  { %1300 = vst [vmem:[#allocation12 + $0xb8] sm:$0xff] %v1001_v35 }
 0x210   :  { %v1004_v44 = vpop.f32.mrb[24].mxu1  ;;  %v1133_v29 = vpop.f32.mrb[68].mxu0 }
 0x211   :  { %v1005_v14 = vadd.f32 %v1004_v44, %v3087_v43  ;;  %v3167_v24 = vadd.f32 %v1133_v29, %v3089_v18  ;;  %v1006_v26 = vpop.f32.mrb[25].mxu1  ;;  %v2084_v21 = vpop.f32.mrb[69].mxu0 }
 0x212   :  { %v1007_v38 = vadd.f32 %v1006_v26, %v3091_v46  ;;  %v1008_v6 = vpop.f32.mrb[26].mxu1  ;;  %v1136_v63 = vpop.f32.mrb[70].mxu0 }
 0x213   :  { %1301 = vst [vmem:[#allocation12 + $0xc0] sm:$0xff] %v1005_v14  ;;  %v1009_v2 = vadd.f32 %v1008_v6, %v3087_v43  ;;  %v3172_v56 = vadd.f32 %v1136_v63, %v3089_v18  ;;  %1343 = vmax.xlane.f32.xlu0 %v3167_v24  ;;  %v1010_v30 = vpop.f32.mrb[27].mxu1  ;;  %v2085_v34 = vpop.f32.mrb[71].mxu0 }
 0x214   :  { %1302 = vst [vmem:[#allocation12 + $0xc8] sm:$0xff] %v1007_v38  ;;  %v1011_v27 = vadd.f32 %v1010_v30, %v3091_v46 }
 0x215   :  { %1303 = vst [vmem:[#allocation12 + $0xd0] sm:$0xff] %v1009_v2  ;;  %1345 = vmax.xlane.f32.xlu1 %v3172_v56 }
 0x216   :  { %1304 = vst [vmem:[#allocation12 + $0xd8] sm:$0xff] %v1011_v27 }
 0x218   :  { %v1014_v1 = vpop.f32.mrb[28].mxu1  ;;  %v1141_v31 = vpop.f32.mrb[72].mxu0 }
 0x219   :  { %v1015_v33 = vadd.f32 %v1014_v1, %v3087_v43  ;;  %v3179_v8 = vadd.f32 %v1141_v31, %v3089_v18  ;;  %v1016_v57 = vpop.f32.mrb[29].mxu1  ;;  %v2088_v25 = vpop.f32.mrb[73].mxu0 }
 0x21a   :  { %v1017_v45 = vadd.f32 %v1016_v57, %v3091_v46  ;;  %v1018_v51 = vpop.f32.mrb[30].mxu1  ;;  %v1144_v55 = vpop.f32.mrb[74].mxu0 }
 0x21b   :  { %1305 = vst [vmem:[#allocation12 + $0xe0] sm:$0xff] %v1015_v33  ;;  %v1019_v36 = vadd.f32 %v1018_v51, %v3087_v43  ;;  %v3184_v37 = vadd.f32 %v1144_v55, %v3089_v18  ;;  %1347 = vmax.xlane.f32.xlu0 %v3179_v8  ;;  %v1020_v39 = vpop.f32.mrb[31].mxu1  ;;  %v2089_v40 = vpop.f32.mrb[75].mxu0 }
 0x21c   :  { %1306 = vst [vmem:[#allocation12 + $0xe8] sm:$0xff] %v1017_v45  ;;  %v1021_v15 = vadd.f32 %v1020_v39, %v3091_v46 }
 0x21d   :  { %1307 = vst [vmem:[#allocation12 + $0xf0] sm:$0xff] %v1019_v36  ;;  %1349 = vmax.xlane.f32.xlu1 %v3184_v37 }
 0x21e   :  { %1308 = vst [vmem:[#allocation12 + $0xf8] sm:$0xff] %v1021_v15 }
 0x220   :  { %v1024_v11 = vpop.f32.mrb[32].mxu1  ;;  %v1149_v54 = vpop.f32.mrb[76].mxu0 }
 0x221   :  { %v1025_v4 = vadd.f32 %v1024_v11, %v3087_v43  ;;  %v3191_v47 = vadd.f32 %v1149_v54, %v3089_v18  ;;  %v1026_v48 = vpop.f32.mrb[33].mxu1  ;;  %v2092_v52 = vpop.f32.mrb[77].mxu0 }
 0x222   :  { %v1027_v23 = vadd.f32 %v1026_v48, %v3091_v46  ;;  %v1028_v58 = vpop.f32.mrb[34].mxu1  ;;  %v1152_v60 = vpop.f32.mrb[78].mxu0 }
 0x223   :  { %1309 = vst [vmem:[#allocation12 + $0x100] sm:$0xff] %v1025_v4  ;;  %v1029_v41 = vadd.f32 %v1028_v58, %v3087_v43  ;;  %v3196_v17 = vadd.f32 %v1152_v60, %v3089_v18  ;;  %1351 = vmax.xlane.f32.xlu0 %v3191_v47  ;;  %v1030_v42 = vpop.f32.mrb[35].mxu1  ;;  %v2093_v12 = vpop.f32.mrb[79].mxu0 }
 0x224   :  { %1310 = vst [vmem:[#allocation12 + $0x108] sm:$0xff] %v1027_v23  ;;  %v1031_v13 = vadd.f32 %v1030_v42, %v3091_v46 }
 0x225   :  { %1311 = vst [vmem:[#allocation12 + $0x110] sm:$0xff] %v1029_v41  ;;  %1353 = vmax.xlane.f32.xlu1 %v3196_v17 }
 0x226   :  { %1312 = vst [vmem:[#allocation12 + $0x118] sm:$0xff] %v1031_v13 }
 0x228   :  { %v1034_v20 = vpop.f32.mrb[36].mxu1  ;;  %v1157_v59 = vpop.f32.mrb[80].mxu0 }
 0x229   :  { %v1035_v3 = vadd.f32 %v1034_v20, %v3087_v43  ;;  %v3203_v9 = vadd.f32 %v1157_v59, %v3089_v18  ;;  %v1036_v62 = vpop.f32.mrb[37].mxu1  ;;  %v2096_v35 = vpop.f32.mrb[81].mxu0 }
 0x22a   :  { %v1037_v44 = vadd.f32 %v1036_v62, %v3091_v46  ;;  %v1038_v29 = vpop.f32.mrb[38].mxu1  ;;  %v1160_v14 = vpop.f32.mrb[82].mxu0 }
 0x22b   :  { %1313 = vst [vmem:[#allocation12 + $0x120] sm:$0xff] %v1035_v3  ;;  %v1039_v26 = vadd.f32 %v1038_v29, %v3087_v43  ;;  %v3208_v21 = vadd.f32 %v1160_v14, %v3089_v18  ;;  %1355 = vmax.xlane.f32.xlu0 %v3203_v9  ;;  %v1040_v38 = vpop.f32.mrb[39].mxu1  ;;  %v2097_v6 = vpop.f32.mrb[83].mxu0 }
 0x22c   :  { %1314 = vst [vmem:[#allocation12 + $0x128] sm:$0xff] %v1037_v44  ;;  %v1041_v63 = vadd.f32 %v1040_v38, %v3091_v46 }
 0x22d   :  { %1315 = vst [vmem:[#allocation12 + $0x130] sm:$0xff] %v1039_v26  ;;  %1357 = vmax.xlane.f32.xlu1 %v3208_v21 }
 0x22e   :  { %1316 = vst [vmem:[#allocation12 + $0x138] sm:$0xff] %v1041_v63 }
 0x230   :  { %v1044_v2 = vpop.f32.mrb[40].mxu1  ;;  %v1165_v30 = vpop.f32.mrb[84].mxu0 }
 0x231   :  { %v1045_v34 = vadd.f32 %v1044_v2, %v3087_v43  ;;  %v3215_v27 = vadd.f32 %v1165_v30, %v3089_v18  ;;  %v1046_v1 = vpop.f32.mrb[41].mxu1  ;;  %v2100_v31 = vpop.f32.mrb[85].mxu0 }
 0x232   :  { %v1047_v33 = vadd.f32 %v1046_v1, %v3091_v46  ;;  %v1048_v57 = vpop.f32.mrb[42].mxu1  ;;  %v1168_v25 = vpop.f32.mrb[86].mxu0 }
 0x233   :  { %1317 = vst [vmem:[#allocation12 + $0x140] sm:$0xff] %v1045_v34  ;;  %1359 = vmax.xlane.f32.xlu0 %v3215_v27  ;;  %v1049_v45 = vpop.f32.mrb[43].mxu1  ;;  %v2101_v51 = vpop.f32.mrb[87].mxu0 }
 0x234   :  { %1318 = vst [vmem:[#allocation12 + $0x148] sm:$0xff] %v1047_v33 }
 0x270   :  { %v1320_v55 = vpop.xlane.xlu0 %1319 }
 0x271   :  { %v1361_v36 = vsub.f32 %v3095_v22, %v1320_v55 }
 0x272   :  { %v1322_v39 = vpop.xlane.xlu1 %1321 }
 0x273   :  { %v1382_v43 = vmul.f32 1.442695, %v1361_v36  ;;  %v1362_v18 = vsub.f32 %v3100_v53, %v1322_v39 }
 0x275   :  { %v1384_v40 = vmul.f32 1.442695, %v1362_v18  ;;  %2271 = vpow2.f32 %v1382_v43 }
 0x277   :  { %2273 = vpow2.f32 %v1384_v40 }
 0x278   :  { %v1324_v15 = vpop.xlane.xlu0 %1323 }
 0x279   :  { %v1363_v46 = vsub.f32 %v3107_v19, %v1324_v15 }
 0x27a   :  { %v1326_v11 = vpop.xlane.xlu1 %1325 }
 0x27b   :  { %v1386_v54 = vmul.f32 1.442695, %v1363_v46  ;;  %v1364_v4 = vsub.f32 %v3112_v5, %v1326_v11 }
 0x27d   :  { %v1388_v48 = vmul.f32 1.442695, %v1364_v4  ;;  %2275 = vpow2.f32 %v1386_v54 }
 0x27f   :  { %2277 = vpow2.f32 %v1388_v48  ;;  %v3223_v52 = vpop.eup %2271 }
 0x280   :  { %v1328_v22 = vpop.xlane.xlu0 %1327 }
 0x281   :  { %v3225_v23 = vpop.eup %2273  ;;  %v1365_v53 = vsub.f32 %v3119_v16, %v1328_v22 }
 0x282   :  { %v1330_v58 = vpop.xlane.xlu1 %1329  ;;  %v1424_v60 = vpack.c.bf16 %v3225_v23, %v3223_v52 }
 0x283   :  { %v1390_v41 = vmul.f32 1.442695, %v1365_v53  ;;  %v1366_v19 = vsub.f32 %v3124_v50, %v1330_v58 }
 0x284   :  { %2119 = vmatmul.mubr.bf16.vlgmr.msra.gmra.mrb[44].mxu1 %v1424_v60 }
 0x285   :  { %v1392_v42 = vmul.f32 1.442695, %v1366_v19  ;;  %2122 = vmatprep.mubr.msk.bf16.mxu1 %vm2553_vm0, %v2552_v0  ;;  %2279 = vpow2.f32 %v1390_v41 }
 0x287   :  { %2281 = vpow2.f32 %v1392_v42  ;;  %v3233_v5 = vpop.eup %2275 }
 0x288   :  { %v1332_v12 = vpop.xlane.xlu0 %1331 }
 0x289   :  { %v3235_v13 = vpop.eup %2277  ;;  %v1367_v16 = vsub.f32 %v3131_v28, %v1332_v12 }
 0x28a   :  { %v1334_v20 = vpop.xlane.xlu1 %1333  ;;  %v1425_v59 = vpack.c.bf16 %v3235_v13, %v3233_v5 }
 0x28b   :  { %v1394_v3 = vmul.f32 1.442695, %v1367_v16  ;;  %v1368_v50 = vsub.f32 %v3136_v32, %v1334_v20 }
 0x28c   :  { %2123 = vmatmul.mubr.bf16.gmra.mrb[48].mxu1 %v1425_v59 }
 0x28d   :  { %v1396_v62 = vmul.f32 1.442695, %v1368_v50  ;;  %2126 = vmatprep.mubr.msk.bf16.mxu1 %vm2553_vm0, %v2552_v0  ;;  %2283 = vpow2.f32 %v1394_v3 }
 0x28f   :  { %2285 = vpow2.f32 %v1396_v62  ;;  %v3243_v35 = vpop.eup %2279 }
 0x290   :  { %v1336_v44 = vpop.xlane.xlu0 %1335 }
 0x291   :  { %v3245_v29 = vpop.eup %2281  ;;  %v1369_v28 = vsub.f32 %v3143_v10, %v1336_v44 }
 0x292   :  { %v1338_v14 = vpop.xlane.xlu1 %1337  ;;  %v1426_v26 = vpack.c.bf16 %v3245_v29, %v3243_v35 }
 0x293   :  { %v1398_v38 = vmul.f32 1.442695, %v1369_v28  ;;  %v1370_v32 = vsub.f32 %v3148_v49, %v1338_v14 }
 0x294   :  { %2127 = vmatmul.mubr.bf16.gmra.mrb[52].mxu1 %v1426_v26 }
 0x295   :  { %v1400_v6 = vmul.f32 1.442695, %v1370_v32  ;;  %2130 = vmatprep.mubr.msk.bf16.mxu1 %vm2553_vm0, %v2552_v0  ;;  %2287 = vpow2.f32 %v1398_v38 }
 0x297   :  { %2289 = vpow2.f32 %v1400_v6  ;;  %v3253_v63 = vpop.eup %2283 }
 0x298   :  { %v1340_v2 = vpop.xlane.xlu0 %1339 }
 0x299   :  { %v3255_v30 = vpop.eup %2285  ;;  %v1371_v10 = vsub.f32 %v3155_v61, %v1340_v2 }
 0x29a   :  { %v1342_v34 = vpop.xlane.xlu1 %1341  ;;  %v1427_v1 = vpack.c.bf16 %v3255_v30, %v3253_v63 }
 0x29b   :  { %v1402_v31 = vmul.f32 1.442695, %v1371_v10  ;;  %v1372_v49 = vsub.f32 %v3160_v7, %v1342_v34 }
 0x29c   :  { %2131 = vmatmul.mubr.bf16.gmra.mrb[56].mxu1 %v1427_v1 }
 0x29d   :  { %v1404_v33 = vmul.f32 1.442695, %v1372_v49  ;;  %2134 = vmatprep.mubr.msk.bf16.mxu1 %vm2553_vm0, %v2552_v0  ;;  %2291 = vpow2.f32 %v1402_v31 }
 0x29f   :  { %2293 = vpow2.f32 %v1404_v33  ;;  %v3263_v57 = vpop.eup %2287 }
 0x2a0   :  { %v1344_v25 = vpop.xlane.xlu0 %1343 }
 0x2a1   :  { %v3265_v45 = vpop.eup %2289  ;;  %v1373_v61 = vsub.f32 %v3167_v24, %v1344_v25 }
 0x2a2   :  { %v1346_v51 = vpop.xlane.xlu1 %1345  ;;  %v1428_v55 = vpack.c.bf16 %v3265_v45, %v3263_v57 }
 0x2a3   :  { %v1406_v36 = vmul.f32 1.442695, %v1373_v61  ;;  %v1374_v7 = vsub.f32 %v3172_v56, %v1346_v51 }
 0x2a4   :  { %2135 = vmatmul.mubr.bf16.gmra.mrb[60].mxu1 %v1428_v55 }
 0x2a5   :  { %v1408_v39 = vmul.f32 1.442695, %v1374_v7  ;;  %2138 = vmatprep.mubr.msk.bf16.mxu1 %vm2553_vm0, %v2552_v0  ;;  %2295 = vpow2.f32 %v1406_v36 }
 0x2a7   :  { %2297 = vpow2.f32 %v1408_v39  ;;  %v3273_v43 = vpop.eup %2291 }
 0x2a8   :  { %v1348_v18 = vpop.xlane.xlu0 %1347 }
 0x2a9   :  { %v3275_v40 = vpop.eup %2293  ;;  %v1375_v24 = vsub.f32 %v3179_v8, %v1348_v18 }
 0x2aa   :  { %v1350_v15 = vpop.xlane.xlu1 %1349  ;;  %v1429_v46 = vpack.c.bf16 %v3275_v40, %v3273_v43 }
 0x2ab   :  { %v1410_v11 = vmul.f32 1.442695, %v1375_v24  ;;  %v1376_v56 = vsub.f32 %v3184_v37, %v1350_v15 }
 0x2ac   :  { %2139 = vmatmul.mubr.bf16.gmra.mrb[64].mxu1 %v1429_v46 }
 0x2ad   :  { %v1412_v54 = vmul.f32 1.442695, %v1376_v56  ;;  %2142 = vmatprep.mubr.msk.bf16.mxu1 %vm2553_vm0, %v2552_v0  ;;  %2299 = vpow2.f32 %v1410_v11 }
 0x2af   :  { %2301 = vpow2.f32 %v1412_v54  ;;  %v3283_v4 = vpop.eup %2295 }
 0x2b0   :  { %v1352_v48 = vpop.xlane.xlu0 %1351 }
 0x2b1   :  { %v3285_v22 = vpop.eup %2297  ;;  %v1377_v8 = vsub.f32 %v3191_v47, %v1352_v48 }
 0x2b2   :  { %v1354_v53 = vpop.xlane.xlu1 %1353  ;;  %v1430_v58 = vpack.c.bf16 %v3285_v22, %v3283_v4 }
 0x2b3   :  { %v1414_v60 = vmul.f32 1.442695, %v1377_v8  ;;  %v1378_v37 = vsub.f32 %v3196_v17, %v1354_v53 }
 0x2b4   :  { %2143 = vmatmul.mubr.bf16.gmra.mrb[68].mxu1 %v1430_v58 }
 0x2b5   :  { %v1416_v41 = vmul.f32 1.442695, %v1378_v37  ;;  %2146 = vmatprep.mubr.msk.bf16.mxu1 %vm2553_vm0, %v2552_v0  ;;  %2303 = vpow2.f32 %v1414_v60 }
 0x2b7   :  { %2305 = vpow2.f32 %v1416_v41  ;;  %v3293_v19 = vpop.eup %2299 }
 0x2b8   :  { %v1356_v42 = vpop.xlane.xlu0 %1355 }
 0x2b9   :  { %v3295_v12 = vpop.eup %2301  ;;  %v1379_v47 = vsub.f32 %v3203_v9, %v1356_v42 }
 0x2ba   :  { %v1358_v16 = vpop.xlane.xlu1 %1357  ;;  %v1431_v20 = vpack.c.bf16 %v3295_v12, %v3293_v19 }
 0x2bb   :  { %v1418_v59 = vmul.f32 1.442695, %v1379_v47  ;;  %v1380_v17 = vsub.f32 %v3208_v21, %v1358_v16 }
 0x2bc   :  { %2147 = vmatmul.mubr.bf16.gmra.mrb[72].mxu1 %v1431_v20 }
 0x2bd   :  { %v1420_v3 = vmul.f32 1.442695, %v1380_v17  ;;  %2150 = vmatprep.mubr.msk.bf16.mxu1 %vm2553_vm0, %v2552_v0  ;;  %2307 = vpow2.f32 %v1418_v59 }
 0x2bf   :  { %2309 = vpow2.f32 %v1420_v3  ;;  %v3303_v50 = vpop.eup %2303 }
 0x2c0   :  { %v1360_v62 = vpop.xlane.xlu0 %1359 }
 0x2c1   :  { %v3305_v44 = vpop.eup %2305  ;;  %v1381_v9 = vsub.f32 %v3215_v27, %v1360_v62 }
 0x2c2   :  { %v1432_v28 = vpack.c.bf16 %v3305_v44, %v3303_v50 }
 0x2c3   :  { %v1422_v14 = vmul.f32 1.442695, %v1381_v9 }
 0x2c4   :  { %2151 = vmatmul.mubr.bf16.gmra.mrb[76].mxu1 %v1432_v28 }
 0x2c5   :  { %2311 = vpow2.f32 %v1422_v14  ;;  %2154 = vmatprep.mubr.msk.bf16.mxu1 %vm2553_vm0, %v2552_v0 }
 0x2c7   :  { %v3312_v21 = vpop.eup %2307 }
 0x2c9   :  { %v3314_v26 = vpop.eup %2309 }
 0x2ca   :  { %v1433_v38 = vpack.c.bf16 %v3314_v26, %v3312_v21 }
 0x2cc   :  { %2155 = vmatmul.mubr.bf16.gmra.mrb[80].mxu1 %v1433_v38 }
 0x2cd   :  { %2158 = vmatprep.mubr.msk.bf16.mxu1 %vm2553_vm0, %v2552_v0 }
 0x2cf   :  { %v3320_v27 = vpop.eup %2311 }
 0x2d0   :  { %v1434_v32 = vpack.c.bf16 %v3320_v27, %v3320_v27 }
 0x2d4   :  { %2159 = vmatmul.mubr.bf16.gmra.mrb[84].mxu1 %v1434_v32 }
 0x2d5   :  { %2476 = shalt.err (!%p2473_p2)
}
 0x2d6   :  { %s2477_s19 = scalar_lea.hbm %s3397_s10, 5376 }
 0x2d7   :  { %p2478_p3 = scmp.ne.s32.totalorder %s3397_s10, %s2477_s19  ;;  %p2481_p4 = scmp.lt.u32.totalorder %s2477_s19, %s3397_s10 }
 0x2d9   :  { %p2483_p5 = pnand %p2481_p4, %p2478_p3 }
 0x2db   :  { %2486 = shalt.err (!%p2483_p5)
}
 0x2dc   :  { %s2557_s24 = smov 256   ;;  %s2558_s25 = smov 16  }
 0x2dd   :  { %1705 = dma.vmem_to_hbm [thread:$0]  %s1700_s14, 5376, %s3397_s10, [#allocation13], %s2557_s24, %s2557_s24, %s2558_s25  }
 0x2de   :  { %s2487_s8 = scalar_lea.vmem %s1688_s0, 1344  ;;  %p2492_p7 = scmp.lt.s32.totalorder %s1688_s0, %s1688_s0 }
 0x2df   :  { %p2488_p6 = scmp.ne.s32.totalorder %s1688_s0, %s2487_s8  ;;  %p2493_p8 = scmp.lt.s32.totalorder %s2487_s8, %s2487_s8 }
 0x2e1   :  { %p2494_p9 = por %p2493_p8, %p2492_p7 }
 0x2e3   :  { %p2495_p10 = pnand %p2494_p9, %p2488_p6 }
 0x2e5   :  { %2498 = shalt.err (!%p2495_p10)
}
 0x2e6   :  { %s2499_s2 = scalar_lea.hbm %s3396_s9, 1344 }
 0x2e7   :  { %p2500_p11 = scmp.ne.s32.totalorder %s3396_s9, %s2499_s2  ;;  %p2503_p12 = scmp.lt.u32.totalorder %s2499_s2, %s3396_s9 }
 0x2e9   :  { %p2505_p13 = pnand %p2503_p12, %p2500_p11 }
 0x2eb   :  { %2508 = shalt.err (!%p2505_p13)
}
 0x2ec   :  { %1693 = dma.vmem_to_hbm [thread:$0]  %s1688_s0, 1344, %s3396_s9, [#allocation4], %s2542_s27, %s2542_s27, %s2543_s28  }
 0x2ed   :  { %s2559_s9 = smov [#allocation14]  }
 0x2ee   :  { %s1711_s27 = sshll.u32 %s2559_s9, 4  ;;  %s1712_s27 = int_to_ptr.vmem [resolvable:$true] %s1711_s27 }
 0x2ef   :  { %s2509_s28 = scalar_lea.vmem %s1712_s27, 2688  ;;  %p2514_p1 = scmp.lt.s32.totalorder %s1712_s27, %s1712_s27 }
 0x2f0   :  { %p2510_p0 = scmp.ne.s32.totalorder %s1712_s27, %s2509_s28  ;;  %p2515_p2 = scmp.lt.s32.totalorder %s2509_s28, %s2509_s28 }
 0x2f2   :  { %p2516_p3 = por %p2515_p2, %p2514_p1 }
 0x2f4   :  { %p2517_p4 = pnand %p2516_p3, %p2510_p0 }
 0x357   :  { %v1533_v0 = vpop.f32.mrb[44].mxu1 }
 0x358   :  { %2313 = vrcp.f32 %v1533_v0  ;;  %v2120_v6 = vpop.f32.mrb[45].mxu1 }
 0x359   :  { %v1536_v2 = vpop.f32.mrb[46].mxu1 }
 0x35a   :  { %2315 = vrcp.f32 %v1536_v2  ;;  %v2121_v10 = vpop.f32.mrb[47].mxu1 }
 0x35f   :  { %v1541_v34 = vpop.f32.mrb[48].mxu1 }
 0x360   :  { %2317 = vrcp.f32 %v1541_v34  ;;  %v2124_v1 = vpop.f32.mrb[49].mxu1 }
 0x361   :  { %v1544_v31 = vpop.f32.mrb[50].mxu1 }
 0x362   :  { %v2314_v49 = vpop.eup %2313  ;;  %2319 = vrcp.f32 %v1544_v31  ;;  %v2125_v33 = vpop.f32.mrb[51].mxu1 }
 0x363   :  { %v1640_v25 = vmul.f32 %v2314_v49, %v3223_v52 }
 0x364   :  { %v2316_v61 = vpop.eup %2315 }
 0x365   :  { %1661 = vst [vmem:[#allocation14] sm:$0xff] %v1640_v25  ;;  %v1641_v51 = vmul.f32 %v2316_v61, %v3225_v23 }
 0x367   :  { %1662 = vst [vmem:[#allocation14 + $0x8] sm:$0xff] %v1641_v51  ;;  %v1549_v55 = vpop.f32.mrb[52].mxu1 }
 0x368   :  { %2321 = vrcp.f32 %v1549_v55  ;;  %v2128_v36 = vpop.f32.mrb[53].mxu1 }
 0x369   :  { %v1552_v7 = vpop.f32.mrb[54].mxu1 }
 0x36a   :  { %v2318_v39 = vpop.eup %2317  ;;  %2323 = vrcp.f32 %v1552_v7  ;;  %v2129_v18 = vpop.f32.mrb[55].mxu1 }
 0x36b   :  { %v1642_v24 = vmul.f32 %v2318_v39, %v3233_v5 }
 0x36c   :  { %v2320_v15 = vpop.eup %2319 }
 0x36d   :  { %1663 = vst [vmem:[#allocation14 + $0x10] sm:$0xff] %v1642_v24  ;;  %v1643_v46 = vmul.f32 %v2320_v15, %v3235_v13 }
 0x36f   :  { %1664 = vst [vmem:[#allocation14 + $0x18] sm:$0xff] %v1643_v46  ;;  %v1557_v52 = vpop.f32.mrb[56].mxu1 }
 0x370   :  { %2325 = vrcp.f32 %v1557_v52  ;;  %v2132_v11 = vpop.f32.mrb[57].mxu1 }
 0x371   :  { %v1560_v56 = vpop.f32.mrb[58].mxu1 }
 0x372   :  { %v2322_v23 = vpop.eup %2321  ;;  %2327 = vrcp.f32 %v1560_v56  ;;  %v2133_v54 = vpop.f32.mrb[59].mxu1 }
 0x373   :  { %v1644_v48 = vmul.f32 %v2322_v23, %v3243_v35 }
 0x374   :  { %v2324_v8 = vpop.eup %2323 }
 0x375   :  { %1665 = vst [vmem:[#allocation14 + $0x20] sm:$0xff] %v1644_v48  ;;  %v1645_v53 = vmul.f32 %v2324_v8, %v3245_v29 }
 0x377   :  { %1666 = vst [vmem:[#allocation14 + $0x28] sm:$0xff] %v1645_v53  ;;  %v1565_v5 = vpop.f32.mrb[60].mxu1 }
 0x378   :  { %2329 = vrcp.f32 %v1565_v5  ;;  %v2136_v58 = vpop.f32.mrb[61].mxu1 }
 0x379   :  { %v1568_v60 = vpop.f32.mrb[62].mxu1 }
 0x37a   :  { %v2326_v13 = vpop.eup %2325  ;;  %2331 = vrcp.f32 %v1568_v60  ;;  %v2137_v37 = vpop.f32.mrb[63].mxu1 }
 0x37b   :  { %v1646_v41 = vmul.f32 %v2326_v13, %v3253_v63 }
 0x37c   :  { %v2328_v42 = vpop.eup %2327 }
 0x37d   :  { %1667 = vst [vmem:[#allocation14 + $0x30] sm:$0xff] %v1646_v41  ;;  %v1647_v47 = vmul.f32 %v2328_v42, %v3255_v30 }
 0x37f   :  { %1668 = vst [vmem:[#allocation14 + $0x38] sm:$0xff] %v1647_v47  ;;  %v1573_v35 = vpop.f32.mrb[64].mxu1 }
 0x380   :  { %2333 = vrcp.f32 %v1573_v35  ;;  %v2140_v16 = vpop.f32.mrb[65].mxu1 }
 0x381   :  { %v1576_v20 = vpop.f32.mrb[66].mxu1 }
 0x382   :  { %v2330_v29 = vpop.eup %2329  ;;  %2335 = vrcp.f32 %v1576_v20  ;;  %v2141_v59 = vpop.f32.mrb[67].mxu1 }
 0x383   :  { %v1648_v17 = vmul.f32 %v2330_v29, %v3263_v57 }
 0x384   :  { %v2332_v3 = vpop.eup %2331 }
 0x385   :  { %1669 = vst [vmem:[#allocation14 + $0x40] sm:$0xff] %v1648_v17  ;;  %v1649_v62 = vmul.f32 %v2332_v3, %v3265_v45 }
 0x387   :  { %1670 = vst [vmem:[#allocation14 + $0x48] sm:$0xff] %v1649_v62  ;;  %v1581_v63 = vpop.f32.mrb[68].mxu1 }
 0x388   :  { %2337 = vrcp.f32 %v1581_v63  ;;  %v2144_v9 = vpop.f32.mrb[69].mxu1 }
 0x389   :  { %v1584_v28 = vpop.f32.mrb[70].mxu1 }
 0x38a   :  { %v2334_v30 = vpop.eup %2333  ;;  %2339 = vrcp.f32 %v1584_v28  ;;  %v2145_v14 = vpop.f32.mrb[71].mxu1 }
 0x38b   :  { %v1650_v38 = vmul.f32 %v2334_v30, %v3273_v43 }
 0x38c   :  { %v2336_v32 = vpop.eup %2335 }
 0x38d   :  { %1671 = vst [vmem:[#allocation14 + $0x50] sm:$0xff] %v1650_v38  ;;  %v1651_v0 = vmul.f32 %v2336_v32, %v3275_v40 }
 0x38f   :  { %1672 = vst [vmem:[#allocation14 + $0x58] sm:$0xff] %v1651_v0  ;;  %v1589_v57 = vpop.f32.mrb[72].mxu1 }
 0x390   :  { %2341 = vrcp.f32 %v1589_v57  ;;  %v2148_v6 = vpop.f32.mrb[73].mxu1 }
 0x391   :  { %v1592_v2 = vpop.f32.mrb[74].mxu1 }
 0x392   :  { %v2338_v45 = vpop.eup %2337  ;;  %2343 = vrcp.f32 %v1592_v2  ;;  %v2149_v10 = vpop.f32.mrb[75].mxu1 }
 0x393   :  { %v1652_v34 = vmul.f32 %v2338_v45, %v3283_v4 }
 0x394   :  { %v2340_v1 = vpop.eup %2339 }
 0x395   :  { %1673 = vst [vmem:[#allocation14 + $0x60] sm:$0xff] %v1652_v34  ;;  %v1653_v31 = vmul.f32 %v2340_v1, %v3285_v22 }
 0x397   :  { %1674 = vst [vmem:[#allocation14 + $0x68] sm:$0xff] %v1653_v31  ;;  %v1597_v43 = vpop.f32.mrb[76].mxu1 }
 0x398   :  { %2345 = vrcp.f32 %v1597_v43  ;;  %v2152_v49 = vpop.f32.mrb[77].mxu1 }
 0x399   :  { %v1600_v33 = vpop.f32.mrb[78].mxu1 }
 0x39a   :  { %v2342_v40 = vpop.eup %2341  ;;  %2347 = vrcp.f32 %v1600_v33  ;;  %v2153_v25 = vpop.f32.mrb[79].mxu1 }
 0x39b   :  { %v1654_v61 = vmul.f32 %v2342_v40, %v3293_v19 }
 0x39c   :  { %v2344_v51 = vpop.eup %2343 }
 0x39d   :  { %1675 = vst [vmem:[#allocation14 + $0x70] sm:$0xff] %v1654_v61  ;;  %v1655_v55 = vmul.f32 %v2344_v51, %v3295_v12 }
 0x39f   :  { %1676 = vst [vmem:[#allocation14 + $0x78] sm:$0xff] %v1655_v55  ;;  %v1605_v4 = vpop.f32.mrb[80].mxu1 }
 0x3a0   :  { %2349 = vrcp.f32 %v1605_v4  ;;  %v2156_v36 = vpop.f32.mrb[81].mxu1 }
 0x3a1   :  { %v1608_v7 = vpop.f32.mrb[82].mxu1 }
 0x3a2   :  { %v2346_v22 = vpop.eup %2345  ;;  %2351 = vrcp.f32 %v1608_v7  ;;  %v2157_v39 = vpop.f32.mrb[83].mxu1 }
 0x3a3   :  { %v1656_v18 = vmul.f32 %v2346_v22, %v3303_v50 }
 0x3a4   :  { %v2348_v24 = vpop.eup %2347 }
 0x3a5   :  { %1677 = vst [vmem:[#allocation14 + $0x80] sm:$0xff] %v1656_v18  ;;  %v1657_v15 = vmul.f32 %v2348_v24, %v3305_v44 }
 0x3a7   :  { %1678 = vst [vmem:[#allocation14 + $0x88] sm:$0xff] %v1657_v15  ;;  %v1613_v19 = vpop.f32.mrb[84].mxu1 }
 0x3a8   :  { %2353 = vrcp.f32 %v1613_v19  ;;  %v2160_v46 = vpop.f32.mrb[85].mxu1 }
 0x3a9   :  { %v1616_v52 = vpop.f32.mrb[86].mxu1 }
 0x3aa   :  { %v2350_v12 = vpop.eup %2349  ;;  %v2161_v11 = vpop.f32.mrb[87].mxu1 }
 0x3ab   :  { %v1658_v56 = vmul.f32 %v2350_v12, %v3312_v21 }
 0x3ac   :  { %v2352_v23 = vpop.eup %2351 }
 0x3ad   :  { %1679 = vst [vmem:[#allocation14 + $0x90] sm:$0xff] %v1658_v56  ;;  %v1659_v54 = vmul.f32 %v2352_v23, %v3314_v26 }
 0x3af   :  { %1680 = vst [vmem:[#allocation14 + $0x98] sm:$0xff] %v1659_v54 }
 0x3b2   :  { %v2354_v50 = vpop.eup %2353 }
 0x3b3   :  { %v1660_v48 = vmul.f32 %v2354_v50, %v3320_v27 }
 0x3b5   :  { %1681 = vst [vmem:[#allocation14 + $0xa0] sm:$0xff] %v1660_v48 }
 0x3b6   :  { %2520 = shalt.err (!%p2517_p4)
}
 0x3b7   :  { %s2521_s0 = scalar_lea.hbm %s3398_s11, 2688 }
 0x3b8   :  { %p2522_p5 = scmp.ne.s32.totalorder %s3398_s11, %s2521_s0  ;;  %p2525_p6 = scmp.lt.u32.totalorder %s2521_s0, %s3398_s11 }
 0x3ba   :  { %p2527_p7 = pnand %p2525_p6, %p2522_p5 }
 0x3bc   :  { %2530 = shalt.err (!%p2527_p7)
}
 0x3bd   :  { %1717 = dma.vmem_to_hbm [thread:$0]  %s1712_s27, 2688, %s3398_s11, [#allocation13], %s2548_s6, %s2548_s6, %s2549_s13  }
 0x3be   :  { %2537 = dma.done.wait [#allocation4], 1344  }
 0x3bf   :  { %2538 = vsyncadd [#allocation4], 4294965952 }
 0x3c0   :  { %2539 = dma.done.wait [#allocation13], 8064  }
 0x3c1   :  { %2540 = vsyncadd [#allocation13], 4294959232 }
 0x3c2   :  { %1727 = vsyncpa [#allocation3], 1 }
 0x3c3   :  { %1728 = vsyncpa [#allocation6], 1 }
 0x3c4   :  { %1729 = vsyncpa [#allocation9], 1 }
 0x3c5   :  { %1730 = vsyncpa [#allocation4], 1 }
 0x3c6   :  { %1731 = vsyncpa [#allocation13], 1 }

</bundles_post_ra>
